<compile_context>
chip_gen: v5e
topology: v5e:2x2
jax: 0.10.0
libtpu: 0.0.40
codegen_flags: <defaults>
</compile_context>

<pallas_src>
import functools
import math

import jax
import jax.numpy as jnp
from jax.experimental import pallas as pl
from jax.experimental.pallas import tpu as pltpu


def _round_up(x, m):
    return ((x + m - 1) // m) * m


def _attn2coarse_kernel(x_ref, gn_ref,
                        wqcat_ref, bqcat_ref,
                        kat_ref, wa2_ref, vt_ref, vpad_ref,
                        ctx_ref, *, d, inv_sqrt_d):
    x = x_ref[...]                                               # [TB, F1] patient tile

    # Fused Q / attention-projection: one wide MXU call, then lane slice.
    q2 = jnp.dot(x, wqcat_ref[...],
                 preferred_element_type=jnp.float32) + bqcat_ref[...]   # [TB, 2D]
    q = q2[:, :d]                                                # [TB, D]
    qa = q2[:, d:]                                               # [TB, D]

    # mlp_attention with N on the lane axis:
    #   hid[b, d, n] = qa[b, d] + ka[n, d]   (ka resident as its [D, N] transpose)
    hid = qa[:, :, None] + kat_ref[...][None, :, :]              # [TB, D, N]
    hid = jnp.where(hid >= 0, hid, 0.1 * hid)                    # LeakyReLU(0.1)
    # wa2 already scaled by 1/temp; ba2 dropped (constant shift, argmax-invariant).
    logits = jnp.sum(hid * wa2_ref[...][None, :, :], axis=1)     # [TB, N]  == sim/temp

    # Hard Gumbel-softmax over genes (forward value == one-hot of first argmax),
    # K independent draws.  Outer 1/temp scaling dropped: argmax is scale-invariant.
    gn = gn_ref[...].astype(jnp.float32)                         # [TB, K, N] (bf16 in HBM)
    pert = logits[:, None, :] + gn                               # [TB, K, N]
    n_genes = pert.shape[-1]
    iota_n = jax.lax.broadcasted_iota(jnp.int32, (1, 1, n_genes), 2)
    pmax = jnp.max(pert, axis=-1, keepdims=True)
    first = jnp.min(jnp.where(pert >= pmax, iota_n, n_genes),
                    axis=-1, keepdims=True)                      # first-argmax index
    mask = (iota_n == first).astype(jnp.float32)                 # [TB, K, N] one-hot

    # scores[b,k] = <Q[b], V[sel(b,k)]> / sqrt(D)  ==  sum_n mask * (Q V^T / sqrt(D))
    qv = jnp.dot(q, vt_ref[...],
                 preferred_element_type=jnp.float32) * inv_sqrt_d  # [TB, N]
    scores = jnp.sum(mask * qv[:, None, :], axis=-1)             # [TB, K]

    # softmax over the K selections (numerically stabilized)
    scores = scores - jnp.max(scores, axis=-1, keepdims=True)
    e = jnp.exp(scores)
    w = e * pl.reciprocal(jnp.sum(e, axis=-1, keepdims=True))    # [TB, K]
    # TODO(synk): nn.Dropout(p=0.3) on the weights applies only in training; inference = identity.

    # context[b] = sum_k w[b,k] * V[sel(b,k)]  ==  (sum_k w * mask) @ V
    # V is resident zero-padded to 128 feature lanes -> lane-dense output store.
    wm = jnp.sum(mask * w[:, :, None], axis=1)                   # [TB, N]
    ctx_ref[...] = jnp.dot(wm, vpad_ref[...],
                           preferred_element_type=jnp.float32).astype(ctx_ref.dtype)


def attention_layer2_coarse_forward(patient, gene, params, gumbel_noise, *, temp=0.5):
    """patient: [B, F1], gene: [N, F2], gumbel_noise: [B, K_sel, N].  Returns context [B, D]."""
    Wq, bq, Wk, bk, Wv, bv, Wa1, ba1, Wa2, ba2 = params
    B, F1 = patient.shape
    N, F2 = gene.shape
    D = Wq.shape[1]
    Ksel = gumbel_noise.shape[1]
    Dp = _round_up(D, 128)                    # lane-dense output width

    # ---- grid-invariant precompute, hoisted out of the kernel (plain XLA) -------
    # Fold mlp_attention's first Linear(2D, D):
    #   cat(Q,K) @ Wa1 + ba1 == x@(Wq@Wa1_q)+bq@Wa1_q  +  (gene@Wk+bk)@Wa1_k + ba1
    Wa1_q, Wa1_k = Wa1[:D, :], Wa1[D:, :]
    Wqcat = jnp.concatenate([Wq, Wq @ Wa1_q], axis=1)            # [F1, 2D]
    bqcat = jnp.concatenate([bq, bq @ Wa1_q], axis=1)            # [1, 2D]
    K_mat = gene @ Wk + bk                                       # [N, D]
    kaT = (K_mat @ Wa1_k + ba1).T                                # [D, N] resident
    V = gene @ Wv + bv                                           # [N, D]
    vT = jnp.asarray(V.T)                                        # [D, N] for Q V^T
    v_pad = jnp.pad(V, ((0, 0), (0, Dp - D)))                    # [N, Dp] for context
    wa2s = (Wa2 * (1.0 / temp)).astype(jnp.float32)              # [D, 1]; ba2 dropped

    gn_bf16 = gumbel_noise.astype(jnp.bfloat16)                  # halve the noise stream

    # ---- batch tiling + explicit VMEM budget -------------------------------------
    VMEM_CAP = 48 << 20  # conservative: fits v7x (64 MiB/TC) with headroom

    def est_vmem(tb):
        act = 2 * (tb * F1 * 4 + tb * Ksel * N * 2 + tb * Dp * 4)       # double-buffered
        res = 2 * 4 * (F1 * 2 * D + 2 * D + D * N + D + D * N + N * Dp)  # residents
        tmp = 4 * (2 * tb * D * N + 4 * tb * Ksel * N + 3 * tb * N + tb * 2 * D)
        return act + res + tmp

    TILE_B = min(128, _round_up(B, 8))
    while est_vmem(TILE_B) > VMEM_CAP and TILE_B > 8:
        TILE_B = max(8, _round_up(TILE_B // 2, 8))
    Bp = _round_up(B, TILE_B)
    # Prefer >= 2 grid tiles so ("parallel",) can shard across both v7x TensorCores.
    if Bp // TILE_B == 1 and TILE_B > 8:
        TILE_B = max(8, _round_up(TILE_B // 2, 8))
        Bp = _round_up(B, TILE_B)
    vmem_limit = int(min(max(2 * est_vmem(TILE_B), 32 << 20), 56 << 20))

    if Bp != B:
        patient_p = jnp.pad(patient, ((0, Bp - B), (0, 0)))
        gn_p = jnp.pad(gn_bf16, ((0, Bp - B), (0, 0), (0, 0)))
    else:
        patient_p, gn_p = patient, gn_bf16

    grid = (Bp // TILE_B,)
    res2 = lambda i: (0, 0)                  # resident block index map

    in_specs = [
        pl.BlockSpec((TILE_B, F1), lambda i: (i, 0)),           # patient tile
        pl.BlockSpec((TILE_B, Ksel, N), lambda i: (i, 0, 0)),   # gumbel noise (bf16)
        pl.BlockSpec((F1, 2 * D), res2),                        # [Wq | Wq@Wa1_q]
        pl.BlockSpec((1, 2 * D), res2),                         # [bq | bq@Wa1_q]
        pl.BlockSpec((D, N), res2),                             # ka^T (folded K proj)
        pl.BlockSpec((D, 1), res2),                             # wa2 / temp
        pl.BlockSpec((D, N), res2),                             # V^T
        pl.BlockSpec((N, Dp), res2),                            # V padded to 128 lanes
    ]
    out_specs = pl.BlockSpec((TILE_B, Dp), lambda i: (i, 0))
    out_shape = jax.ShapeDtypeStruct((Bp, Dp), jnp.float32)

    flops = int(2 * Bp * F1 * 2 * D          # fused q/qa projection
                + 5 * Bp * N * D             # hid add / leaky / weighted reduce
                + 2 * Bp * D * N             # Q V^T
                + 7 * Bp * Ksel * N          # gumbel argmax / mask / scores / wm
                + 2 * Bp * N * Dp)           # wm @ V_pad
    bytes_accessed = int(4 * (Bp * F1 + Bp * Dp + F1 * 2 * D + 2 * D
                              + 2 * D * N + D + N * Dp)
                         + 2 * Bp * Ksel * N)
    cost = pl.CostEstimate(flops=flops, transcendentals=int(Bp * Ksel),
                           bytes_accessed=bytes_accessed)

    kernel = functools.partial(_attn2coarse_kernel, d=D,
                               inv_sqrt_d=float(1.0 / math.sqrt(D)))

    ctx_p = pl.pallas_call(
        kernel,
        out_shape=out_shape,
        grid=grid,
        in_specs=in_specs,
        out_specs=out_specs,
        compiler_params=pltpu.CompilerParams(
            dimension_semantics=("parallel",),
            vmem_limit_bytes=vmem_limit),
        cost_estimate=cost,
    )(patient_p, gn_p, Wqcat, bqcat, kaT, wa2s, vT, v_pad)

    return ctx_p[:B, :D]


def reference_forward(patient, gene, params, gnoise, *, temp=0.5):
    """Pure-JAX mirror of the PyTorch forward (same gumbel noise)."""
    Wq, bq, Wk, bk, Wv, bv, Wa1, ba1, Wa2, ba2 = params
    Q = patient @ Wq + bq                       # [B, D]
    Km = gene @ Wk + bk                         # [N, D]
    V = gene @ Wv + bv                          # [N, D]
    B, D = Q.shape
    N = Km.shape[0]
    q_exp = jnp.broadcast_to(Q[:, None, :], (B, N, D))
    k_exp = jnp.broadcast_to(Km[None, :, :], (B, N, D))
    qk = jnp.concatenate([q_exp, k_exp], axis=-1)
    h = qk @ Wa1 + ba1
    h = jnp.where(h >= 0, h, 0.1 * h)
    sim = (h @ Wa2)[..., 0] + ba2[0, 0]         # [B, N]
    logits = sim / temp
    pert = (logits[:, None, :] + gnoise) / temp  # [B, K, N]
    idx = jnp.argmax(pert, axis=-1)
    mask = jax.nn.one_hot(idx, N, dtype=jnp.float32)
    topk = jnp.einsum('bkn,nd->bkd', mask, V)
    scores = jnp.sum(Q[:, None, :] * topk, axis=-1) / math.sqrt(D)
    w = jax.nn.softmax(scores, axis=-1)
    return jnp.sum(w[..., None] * topk, axis=1)


def init_params(key, in_features, in_features2, out_features):
    """Deterministic synthetic parameters (same shapes as the PyTorch module)."""
    ks = jax.random.split(key, 10)

    def lin(kw, kb, fi, fo):
        bound = 1.0 / math.sqrt(fi)
        w = jax.random.uniform(kw, (fi, fo), jnp.float32, -bound, bound)
        b = jax.random.uniform(kb, (1, fo), jnp.float32, -bound, bound)
        return w, b

    Wq, bq = lin(ks[0], ks[1], in_features, out_features)          # query
    Wk, bk = lin(ks[2], ks[3], in_features2, out_features)         # key
    Wv, bv = lin(ks[4], ks[5], in_features2, out_features)         # value
    Wa1, ba1 = lin(ks[6], ks[7], 2 * out_features, out_features)   # mlp_attention[0]
    Wa2, ba2 = lin(ks[8], ks[9], out_features, 1)                  # mlp_attention[2]
    return (Wq, bq, Wk, bk, Wv, bv, Wa1, ba1, Wa2, ba2)


if __name__ == "__main__":
    key = jax.random.PRNGKey(0)
    k_pat, k_gene, k_par, k_noise = jax.random.split(key, 4)

    B, F1, F2, D, N, K_SEL, TEMP = 2, 16, 16, 32, 64, 20, 0.5
    patient = jax.random.normal(k_pat, (B, F1), jnp.float32)
    gene = jax.random.normal(k_gene, (N, F2), jnp.float32)
    params = init_params(k_par, F1, F2, D)
    # F.gumbel_softmax noise, generated once in the wrapper (deterministic from the key).
    gnoise = jax.random.gumbel(k_noise, (B, K_SEL, N), jnp.float32)

    context = attention_layer2_coarse_forward(patient, gene, params, gnoise, temp=TEMP)
    jax.block_until_ready(context)

    # Reference uses the same bf16-rounded noise the kernel consumes, so the
    # (measure-zero-tie) argmax selection is bit-identical.
    gnoise_rt = gnoise.astype(jnp.bfloat16).astype(jnp.float32)
    context_ref = reference_forward(patient, gene, params, gnoise_rt, temp=TEMP)
    assert context.shape == (B, D)
    assert jnp.allclose(context, context_ref, atol=2e-4, rtol=2e-4)

    print("KERNEL_OK")
</pallas_src>

<mosaic_0001>
module attributes {stable_mosaic.version = 11 : i64} {
  func.func @_attn2coarse_kernel(%arg0: i32, %arg1: memref<8x16xf32, #tpu.memory_space<vmem>>, %arg2: memref<8x20x64xbf16, #tpu.memory_space<vmem>>, %arg3: memref<16x64xf32, #tpu.memory_space<vmem>>, %arg4: memref<1x64xf32, #tpu.memory_space<vmem>>, %arg5: memref<32x64xf32, #tpu.memory_space<vmem>>, %arg6: memref<32x1xf32, #tpu.memory_space<vmem>>, %arg7: memref<32x64xf32, #tpu.memory_space<vmem>>, %arg8: memref<64x128xf32, #tpu.memory_space<vmem>>, %arg9: memref<8x128xf32, #tpu.memory_space<vmem>>) attributes {dimension_semantics = [#tpu.dimension_semantics<parallel>], iteration_bounds = array<i64: 1>, scalar_prefetch = 0 : i64, scratch_operands = 0 : i64, tpu.core_type = #tpu.core_type<tc>, window_params = [{transform_indices = @transform_0, window_bounds = array<i64: 8, 16>}, {transform_indices = @transform_1, window_bounds = array<i64: 8, 20, 64>}, {pipeline_mode = #tpu.pipeline_mode<synchronous>, transform_indices = @transform_2, window_bounds = array<i64: 16, 64>}, {pipeline_mode = #tpu.pipeline_mode<synchronous>, transform_indices = @transform_3, window_bounds = array<i64: 1, 64>}, {pipeline_mode = #tpu.pipeline_mode<synchronous>, transform_indices = @transform_4, window_bounds = array<i64: 32, 64>}, {pipeline_mode = #tpu.pipeline_mode<synchronous>, transform_indices = @transform_5, window_bounds = array<i64: 32, 1>}, {pipeline_mode = #tpu.pipeline_mode<synchronous>, transform_indices = @transform_6, window_bounds = array<i64: 32, 64>}, {pipeline_mode = #tpu.pipeline_mode<synchronous>, transform_indices = @transform_7, window_bounds = array<i64: 64, 128>}, {transform_indices = @transform_8, window_bounds = array<i64: 8, 128>}]} {
    %c0 = arith.constant 0 : index
    %c0_0 = arith.constant 0 : index
    %0 = vector.load %arg1[%c0, %c0_0] : memref<8x16xf32, #tpu.memory_space<vmem>>, vector<8x16xf32>
    %c0_1 = arith.constant 0 : index
    %c0_2 = arith.constant 0 : index
    %1 = vector.load %arg3[%c0_1, %c0_2] : memref<16x64xf32, #tpu.memory_space<vmem>>, vector<16x64xf32>
    %cst = arith.constant dense<0.000000e+00> : vector<8x64xf32>
    %2 = tpu.matmul %0, %1, %cst {dimension_numbers = #tpu.dot_dimension_numbers<[1], [0], [0], [1], [0, 0, 1, 1], [], []>} : vector<8x16xf32>, vector<16x64xf32>, vector<8x64xf32> -> vector<8x64xf32>
    %c0_3 = arith.constant 0 : index
    %c0_4 = arith.constant 0 : index
    %3 = vector.load %arg4[%c0_3, %c0_4] : memref<1x64xf32, #tpu.memory_space<vmem>>, vector<1x64xf32>
    %4 = vector.broadcast %3 : vector<1x64xf32> to vector<8x64xf32>
    %5 = arith.addf %2, %4 : vector<8x64xf32>
    %6 = vector.extract_strided_slice %5 {offsets = [0, 0], sizes = [8, 32], strides = [1, 1]} : vector<8x64xf32> to vector<8x32xf32>
    %7 = vector.extract_strided_slice %5 {offsets = [0, 32], sizes = [8, 32], strides = [1, 1]} : vector<8x64xf32> to vector<8x32xf32>
    %8 = vector.shape_cast %7 : vector<8x32xf32> to vector<8x32x1xf32>
    %c0_5 = arith.constant 0 : index
    %c0_6 = arith.constant 0 : index
    %9 = vector.load %arg5[%c0_5, %c0_6] : memref<32x64xf32, #tpu.memory_space<vmem>>, vector<32x64xf32>
    %10 = vector.shape_cast %9 : vector<32x64xf32> to vector<1x32x64xf32>
    %11 = vector.broadcast %8 : vector<8x32x1xf32> to vector<8x32x64xf32>
    %12 = vector.broadcast %10 : vector<1x32x64xf32> to vector<8x32x64xf32>
    %13 = arith.addf %11, %12 : vector<8x32x64xf32>
    %cst_7 = arith.constant 0.000000e+00 : f32
    %14 = vector.broadcast %cst_7 : f32 to vector<8x32x64xf32>
    %15 = arith.cmpf oge, %13, %14 : vector<8x32x64xf32>
    %cst_8 = arith.constant 1.000000e-01 : f32
    %16 = vector.broadcast %cst_8 : f32 to vector<8x32x64xf32>
    %17 = arith.mulf %16, %13 : vector<8x32x64xf32>
    %18 = arith.select %15, %13, %17 : vector<8x32x64xi1>, vector<8x32x64xf32>
    %c0_9 = arith.constant 0 : index
    %c0_10 = arith.constant 0 : index
    %19 = vector.load %arg6[%c0_9, %c0_10] : memref<32x1xf32, #tpu.memory_space<vmem>>, vector<32x1xf32>
    %20 = vector.shape_cast %19 : vector<32x1xf32> to vector<1x32x1xf32>
    %21 = vector.broadcast %20 : vector<1x32x1xf32> to vector<8x32x64xf32>
    %22 = arith.mulf %18, %21 : vector<8x32x64xf32>
    %cst_11 = arith.constant dense<0.000000e+00> : vector<8x64xf32>
    %23 = vector.multi_reduction <add>, %22, %cst_11 [1] : vector<8x32x64xf32> to vector<8x64xf32>
    %c0_12 = arith.constant 0 : index
    %c0_13 = arith.constant 0 : index
    %c0_14 = arith.constant 0 : index
    %24 = vector.load %arg2[%c0_12, %c0_13, %c0_14] : memref<8x20x64xbf16, #tpu.memory_space<vmem>>, vector<8x20x64xbf16>
    %25 = arith.extf %24 : vector<8x20x64xbf16> to vector<8x20x64xf32>
    %26 = vector.shape_cast %23 : vector<8x64xf32> to vector<8x1x64xf32>
    %27 = vector.broadcast %26 : vector<8x1x64xf32> to vector<8x20x64xf32>
    %28 = arith.addf %27, %25 : vector<8x20x64xf32>
    %29 = tpu.iota {dimensions = array<i32: 2>} : vector<1x1x64xi32>
    %cst_15 = arith.constant dense<0xFF800000> : vector<8x20xf32>
    %30 = vector.multi_reduction <maximumf>, %28, %cst_15 [2] : vector<8x20x64xf32> to vector<8x20xf32>
    %31 = vector.shape_cast %30 : vector<8x20xf32> to vector<8x20x1xf32>
    %32 = vector.broadcast %31 : vector<8x20x1xf32> to vector<8x20x64xf32>
    %33 = arith.cmpf oge, %28, %32 : vector<8x20x64xf32>
    %c64_i32 = arith.constant 64 : i32
    %34 = vector.shape_cast %29 : vector<1x1x64xi32> to vector<1x1x64xi32>
    %35 = vector.broadcast %34 : vector<1x1x64xi32> to vector<8x20x64xi32>
    %36 = vector.broadcast %c64_i32 : i32 to vector<8x20x64xi32>
    %37 = arith.select %33, %35, %36 : vector<8x20x64xi1>, vector<8x20x64xi32>
    %cst_16 = arith.constant dense<2147483647> : vector<8x20xi32>
    %38 = vector.multi_reduction <minsi>, %37, %cst_16 [2] : vector<8x20x64xi32> to vector<8x20xi32>
    %39 = vector.shape_cast %38 : vector<8x20xi32> to vector<8x20x1xi32>
    %40 = vector.broadcast %29 : vector<1x1x64xi32> to vector<8x20x64xi32>
    %41 = vector.broadcast %39 : vector<8x20x1xi32> to vector<8x20x64xi32>
    %42 = arith.cmpi eq, %40, %41 : vector<8x20x64xi32>
    %43 = arith.extui %42 : vector<8x20x64xi1> to vector<8x20x64xi32>
    %44 = arith.sitofp %43 : vector<8x20x64xi32> to vector<8x20x64xf32>
    %c0_17 = arith.constant 0 : index
    %c0_18 = arith.constant 0 : index
    %45 = vector.load %arg7[%c0_17, %c0_18] : memref<32x64xf32, #tpu.memory_space<vmem>>, vector<32x64xf32>
    %cst_19 = arith.constant dense<0.000000e+00> : vector<8x64xf32>
    %46 = tpu.matmul %6, %45, %cst_19 {dimension_numbers = #tpu.dot_dimension_numbers<[1], [0], [0], [1], [0, 0, 1, 1], [], []>} : vector<8x32xf32>, vector<32x64xf32>, vector<8x64xf32> -> vector<8x64xf32>
    %cst_20 = arith.constant 0.176776692 : f32
    %47 = vector.broadcast %cst_20 : f32 to vector<8x64xf32>
    %48 = arith.mulf %46, %47 : vector<8x64xf32>
    %49 = vector.shape_cast %48 : vector<8x64xf32> to vector<8x1x64xf32>
    %50 = vector.broadcast %49 : vector<8x1x64xf32> to vector<8x20x64xf32>
    %51 = arith.mulf %44, %50 : vector<8x20x64xf32>
    %cst_21 = arith.constant dense<0.000000e+00> : vector<8x20xf32>
    %52 = vector.multi_reduction <add>, %51, %cst_21 [2] : vector<8x20x64xf32> to vector<8x20xf32>
    %cst_22 = arith.constant dense<0xFF800000> : vector<8xf32>
    %53 = vector.multi_reduction <maximumf>, %52, %cst_22 [1] : vector<8x20xf32> to vector<8xf32>
    %54 = vector.shape_cast %53 : vector<8xf32> to vector<8x1xf32>
    %55 = vector.broadcast %54 : vector<8x1xf32> to vector<8x20xf32>
    %56 = arith.subf %52, %55 : vector<8x20xf32>
    %57 = math.exp %56 : vector<8x20xf32>
    %cst_23 = arith.constant dense<0.000000e+00> : vector<8xf32>
    %58 = vector.multi_reduction <add>, %57, %cst_23 [1] : vector<8x20xf32> to vector<8xf32>
    %59 = vector.shape_cast %58 : vector<8xf32> to vector<8x1xf32>
    %60 = tpu.reciprocal %59 : vector<8x1xf32> -> vector<8x1xf32>
    %61 = vector.broadcast %60 : vector<8x1xf32> to vector<8x20xf32>
    %62 = arith.mulf %57, %61 : vector<8x20xf32>
    %63 = vector.shape_cast %62 : vector<8x20xf32> to vector<8x20x1xf32>
    %64 = vector.broadcast %63 : vector<8x20x1xf32> to vector<8x20x64xf32>
    %65 = arith.mulf %44, %64 : vector<8x20x64xf32>
    %cst_24 = arith.constant dense<0.000000e+00> : vector<8x64xf32>
    %66 = vector.multi_reduction <add>, %65, %cst_24 [1] : vector<8x20x64xf32> to vector<8x64xf32>
    %c0_25 = arith.constant 0 : index
    %c0_26 = arith.constant 0 : index
    %67 = vector.load %arg8[%c0_25, %c0_26] : memref<64x128xf32, #tpu.memory_space<vmem>>, vector<64x128xf32>
    %cst_27 = arith.constant dense<0.000000e+00> : vector<8x128xf32>
    %68 = tpu.matmul %66, %67, %cst_27 {dimension_numbers = #tpu.dot_dimension_numbers<[1], [0], [0], [1], [0, 0, 1, 1], [], []>} : vector<8x64xf32>, vector<64x128xf32>, vector<8x128xf32> -> vector<8x128xf32>
    %c0_28 = arith.constant 0 : index
    %c0_29 = arith.constant 0 : index
    %69 = vector.load %arg9[%c0_28, %c0_29] : memref<8x128xf32, #tpu.memory_space<vmem>>, vector<8x128xf32>
    tpu.vector_store %arg9[%c0_28, %c0_29], %68 {strides = array<i32>} : memref<8x128xf32, #tpu.memory_space<vmem>>, vector<8x128xf32>,
    return
  }
  func.func @transform_0(%arg0: i32) -> (i32, i32) {
    %c0_i32 = arith.constant 0 : i32
    %c0_i32_0 = arith.constant 0 : i32
    return %arg0, %c0_i32 : i32, i32
  }
  func.func @transform_1(%arg0: i32) -> (i32, i32, i32) {
    %c0_i32 = arith.constant 0 : i32
    %c0_i32_0 = arith.constant 0 : i32
    %c0_i32_1 = arith.constant 0 : i32
    return %arg0, %c0_i32, %c0_i32_0 : i32, i32, i32
  }
  func.func @transform_2(%arg0: i32) -> (i32, i32) {
    %c0_i32 = arith.constant 0 : i32
    %c0_i32_0 = arith.constant 0 : i32
    %c0_i32_1 = arith.constant 0 : i32
    return %c0_i32, %c0_i32_0 : i32, i32
  }
  func.func @transform_3(%arg0: i32) -> (i32, i32) {
    %c0_i32 = arith.constant 0 : i32
    %c0_i32_0 = arith.constant 0 : i32
    %c0_i32_1 = arith.constant 0 : i32
    return %c0_i32, %c0_i32_0 : i32, i32
  }
  func.func @transform_4(%arg0: i32) -> (i32, i32) {
    %c0_i32 = arith.constant 0 : i32
    %c0_i32_0 = arith.constant 0 : i32
    %c0_i32_1 = arith.constant 0 : i32
    return %c0_i32, %c0_i32_0 : i32, i32
  }
  func.func @transform_5(%arg0: i32) -> (i32, i32) {
    %c0_i32 = arith.constant 0 : i32
    %c0_i32_0 = arith.constant 0 : i32
    %c0_i32_1 = arith.constant 0 : i32
    return %c0_i32, %c0_i32_0 : i32, i32
  }
  func.func @transform_6(%arg0: i32) -> (i32, i32) {
    %c0_i32 = arith.constant 0 : i32
    %c0_i32_0 = arith.constant 0 : i32
    %c0_i32_1 = arith.constant 0 : i32
    return %c0_i32, %c0_i32_0 : i32, i32
  }
  func.func @transform_7(%arg0: i32) -> (i32, i32) {
    %c0_i32 = arith.constant 0 : i32
    %c0_i32_0 = arith.constant 0 : i32
    %c0_i32_1 = arith.constant 0 : i32
    return %c0_i32, %c0_i32_0 : i32, i32
  }
  func.func @transform_8(%arg0: i32) -> (i32, i32) {
    %c0_i32 = arith.constant 0 : i32
    %c0_i32_0 = arith.constant 0 : i32
    return %arg0, %c0_i32 : i32, i32
  }
}

</mosaic_0001>

<bundles_post_ra>
// kernel: tpu_custom_call.1
= control target key start
LH: loop header
LB: loop body
LE: loop exit
PB: predicated region body
PF: predicated region fallthrough
CT: control target
= control target key end

     0   :  { %v62_v2 = vlaneseq  ;;  %vm37_vm0 = vcmask 130048   ;;  %v2166_v4 = vmov 0   ;;  %s3512_s0 = inlined_call_operand.vmem [shape: f32[8,16], index: 0, kind: input, shape index: {}]   ;;  %s3513_s1 = inlined_call_operand.vmem [shape: bf16[8,20,64], index: 1, kind: input, shape index: {}]   ;;  %s3514_s2 = inlined_call_operand.vmem [shape: f32[16,64], index: 2, kind: input, shape index: {}]   ;;  %s3515_s3 = inlined_call_operand.vmem [shape: f32[1,64], index: 3, kind: input, shape index: {}]   ;;  %s3516_s4 = inlined_call_operand.vmem [shape: f32[32,64], index: 4, kind: input, shape index: {}]   ;;  %s3517_s5 = inlined_call_operand.vmem [shape: f32[32,1], index: 5, kind: input, shape index: {}]   ;;  %s3518_s6 = inlined_call_operand.vmem [shape: f32[32,64], index: 6, kind: input, shape index: {}]   ;;  %s3519_s7 = inlined_call_operand.vmem [shape: f32[64,128], index: 7, kind: input, shape index: {}]   ;;  %s3520_s8 = inlined_call_operand.hbm [shape: f32[8,128], index: 8, kind: output, shape index: {}]  }
   0x1   :  { %v32_v0 = vld [vmem:[%s3514_s2 + $0x8] sm:$0xff]  ;;  %v31_v1 = vld [vmem:[%s3514_s2] sm:$0xff]  ;;  %2051 = vset.pattern.permute.xlu2 %v2166_v4  ;;  %v395_v6 = vld [vmem:[%s3517_s5 + $0x10] sm:$0xff]  ;;  %2053 = vset.pattern.permute.xlu1 %v2166_v4 }
   0x2   :  { %55 = vmatpush.msra.mxu0 %v32_v0  ;;  %v30_v3 = vld [vmem:[%s3512_s0] sm:$0xff]  ;;  %v394_v7 = vld [vmem:[%s3517_s5 + $0x8] sm:$0xff]  ;;  %v1184_v8 = vld [vmem:[%s3518_s6 + $0x18] sm:$0xff]  ;;  %2052 = vset.pattern.permute.xlu0 %v2166_v4 }
   0x3   :  { %v393_v5 = vld [vmem:[%s3517_s5] sm:$0xff] }
   0x4   :  { %399 = vperm.xlu2 %2051, %v393_v5   ;;  %56 = vmatpush.msra.mxu0 %v31_v1 }
   0x5   :  { %13 = vsyncpa [#allocation3], 0  ;;  %2002 = vmatmul.msk.f32.vlgmr.msra.gmra.mxu0 %vm37_vm0, %v30_v3  ;;  %409 = vperm.xlu1 %2053, %v395_v6   ;;  %v63_v9 = vshrl.u32 %v62_v2, 7  ;;  %v1183_v10 = vld [vmem:[%s3518_s6 + $0x10] sm:$0xff]  ;;  %v396_v11 = vld [vmem:[%s3517_s5 + $0x18] sm:$0xff]  ;;  %vm1185_vm1 = vcmask 261120  }
   0x6   :  { %404 = vperm.xlu0 %2052, %v394_v7   ;;  %1201 = vmatpush.msra.mxu1 %v1184_v8  ;;  %v1182_v14 = vld [vmem:[%s3518_s6 + $0x8] sm:$0xff]  ;;  %v1181_v15 = vld [vmem:[%s3518_s6] sm:$0xff]  ;;  %v2315_v34 = vld [vmem:[%s3516_s4 + $0x10] sm:$0xff]  ;;  %vm449_vm6 = vcmask 523264   ;;  %vm634_vm7 = vcmask 519168   ;;  %s1993_s26 = sshll.u32 %s3520_s8, 4  ;;  %s1994_s26 = int_to_ptr.hbm [resolvable:$true] %s1993_s26 }
   0x7   :  { %v2245_v12 = vadd.s32 48, %v63_v9  ;;  %v2247_v13 = vadd.s32 32, %v63_v9  ;;  %v2089_v16 = vld [vmem:[%s3515_s3] ss:$0 sm:$0xff]  ;;  %v2266_v21 = vadd.s32 40, %v63_v9  ;;  %v2268_v22 = vadd.s32 56, %v63_v9 }
   0x8   :  { %1202 = vmatpush.msra.mxu1 %v1183_v10  ;;  %v2310_v33 = vld [vmem:[%s3516_s4] sm:$0xff]  ;;  %v2322_v39 = vld [vmem:[%s3516_s4 + $0x18] sm:$0xff]  ;;  %v2327_v41 = vld [vmem:[%s3516_s4 + $0x8] sm:$0xff] }
   0x9   :  { %v556_v7 = vld [vmem:[%s3513_s1 + $0x8] sm:$0x3] }
   0xa   :  { %1203 = vmatpush.msra.mxu1 %v1182_v14 }
   0xc   :  { %414 = vperm.xlu2 %2051, %v396_v11   ;;  %1204 = vmatpush.msra.mxu1 %v1181_v15  ;;  %v580_v11 = vunpack.c.l.bf16 %v556_v7 }
   0xd   :  { %2056 = vset.pattern.permute.xlu1 %v2245_v12 }
   0xe   :  { %2054 = vset.pattern.permute.xlu0 %v2247_v13 }
  0x14   :  { %2058 = vset.pattern.permute.xlu2 %v2247_v13 }
  0x5e   :  { %v2305_v31 = vpop.permute.xlu2 %399 }
  0x66   :  { %v2330_v44 = vpop.permute.xlu2 %414 }
  0x77   :  { %v2301_v29 = vpop.permute.xlu1 %409 }
  0x78   :  { %v2299_v28 = vpop.permute.xlu0 %404 }
  0x82   :  { %v58_v17 = vpop.f32.mrf.mxu0 }
  0x83   :  { %v2261_v18 = vadd.f32 %v2089_v16, %v58_v17 }
  0x85   :  { %2027 = vmatmul.msk.f32.vlgmr.msra.gmra.mxu1 %vm1185_vm1, %v2261_v18  ;;  %v86_v19 = vperm.slane %v2261_v18, 1  ;;  %v61_v20 = vperm.slane %v2261_v18, 0  ;;  %v111_v23 = vperm.slane %v2261_v18, 2  ;;  %v136_v24 = vperm.slane %v2261_v18, 3 }
  0x86   :  { %v161_v25 = vperm.slane %v2261_v18, 4  ;;  %v186_v26 = vperm.slane %v2261_v18, 5  ;;  %v2293_v27 = vperm.slane %v2261_v18, 7  ;;  %v211_v62 = vperm.slane %v2261_v18, 6 }
  0x87   :  { %91 = vperm.xlu2 %2058, %v86_v19   ;;  %78 = vperm.xlu1 %2056, %v61_v20  }
  0x88   :  { %66 = vperm.xlu0 %2054, %v61_v20  }
  0x8f   :  { %2059 = vset.pattern.permute.xlu2 %v2266_v21  ;;  %2057 = vset.pattern.permute.xlu1 %v2268_v22 }
  0x90   :  { %2055 = vset.pattern.permute.xlu0 %v2266_v21 }
  0x97   :  { %97 = vperm.xlu2 %2059, %v86_v19   ;;  %84 = vperm.xlu1 %2057, %v61_v20  }
  0x98   :  { %72 = vperm.xlu0 %2055, %v61_v20  }
  0x9f   :  { %2061 = vset.pattern.permute.xlu2 %v2268_v22  ;;  %2060 = vset.pattern.permute.xlu1 %v2245_v12 }
  0xa0   :  { %2062 = vset.pattern.permute.xlu0 %v2247_v13 }
  0xa7   :  { %109 = vperm.xlu2 %2061, %v86_v19   ;;  %103 = vperm.xlu1 %2060, %v86_v19  }
  0xa8   :  { %116 = vperm.xlu0 %2062, %v111_v23  }
  0xaf   :  { %2064 = vset.pattern.permute.xlu2 %v2245_v12  ;;  %2063 = vset.pattern.permute.xlu1 %v2266_v21 }
  0xb0   :  { %2067 = vset.pattern.permute.xlu0 %v2266_v21 }
  0xb7   :  { %128 = vperm.xlu2 %2064, %v111_v23   ;;  %122 = vperm.xlu1 %2063, %v111_v23  }
  0xb8   :  { %147 = vperm.xlu0 %2067, %v136_v24  }
  0xbf   :  { %2066 = vset.pattern.permute.xlu2 %v2247_v13  ;;  %2065 = vset.pattern.permute.xlu1 %v2268_v22 }
  0xc0   :  { %2072 = vset.pattern.permute.xlu0 %v2245_v12 }
  0xc7   :  { %141 = vperm.xlu2 %2066, %v136_v24   ;;  %134 = vperm.xlu1 %2065, %v111_v23  }
  0xc8   :  { %178 = vperm.xlu0 %2072, %v161_v25  }
  0xcf   :  { %2069 = vset.pattern.permute.xlu2 %v2268_v22  ;;  %2068 = vset.pattern.permute.xlu1 %v2245_v12 }
  0xd0   :  { %2077 = vset.pattern.permute.xlu0 %v2268_v22 }
  0xd7   :  { %159 = vperm.xlu2 %2069, %v136_v24   ;;  %153 = vperm.xlu1 %2068, %v136_v24  }
  0xd8   :  { %209 = vperm.xlu0 %2077, %v186_v26  }
  0xdf   :  { %2071 = vset.pattern.permute.xlu2 %v2266_v21  ;;  %2070 = vset.pattern.permute.xlu1 %v2247_v13 }
  0xe0   :  { %2082 = vset.pattern.permute.xlu0 %v2247_v13 }
  0xe1   :  { %v92_v60 = vpop.permute.xlu2 %91 }
  0xe2   :  { %v269_v24 = vadd.f32 %v2310_v33, %v92_v60 }
  0xe4   :  { %vm301_vm10 = vcmp.ge.f32.partialorder %v269_v24, 0.0 }
  0xe7   :  { %172 = vperm.xlu2 %2071, %v161_v25   ;;  %166 = vperm.xlu1 %2070, %v161_v25  }
  0xe8   :  { %241 = vperm.xlu0 %2082, %v2293_v27  }
  0xef   :  { %2074 = vset.pattern.permute.xlu2 %v2247_v13  ;;  %2073 = vset.pattern.permute.xlu1 %v2268_v22 }
  0xf0   :  { %2088 = vset.pattern.permute.xlu0 %v2166_v4 }
  0xf1   :  { %v98_v5 = vpop.permute.xlu2 %97 }
  0xf7   :  { %191 = vperm.xlu2 %2074, %v186_v26   ;;  %184 = vperm.xlu1 %2073, %v161_v25  }
  0xf9   :  { %v79_v32 = vpop.permute.xlu1 %78 }
  0xfa   :  { %v67_v30 = vpop.permute.xlu0 %66  ;;  %v267_v36 = vadd.f32 %v2315_v34, %v79_v32 }
  0xfb   :  { %v265_v35 = vadd.f32 %v2310_v33, %v67_v30 }
  0xfc   :  { %v331_v38 = vmul.f32 0.1, %v267_v36  ;;  %vm299_vm3 = vcmp.ge.f32.partialorder %v267_v36, 0.0 }
  0xfd   :  { %v329_v37 = vmul.f32 0.1, %v265_v35  ;;  %vm297_vm2 = vcmp.ge.f32.partialorder %v265_v35, 0.0 }
  0xfe   :  { %v363_v48 = vsel %vm299_vm3, %v267_v36, %v331_v38  ;;  %v333_v36 = vmul.f32 0.1, %v269_v24 }
  0xff   :  { %2076 = vset.pattern.permute.xlu2 %v2245_v12  ;;  %2075 = vset.pattern.permute.xlu1 %v2266_v21  ;;  %v361_v45 = vsel %vm297_vm2, %v265_v35, %v329_v37  ;;  %v419_v53 = vmul.f32 %v2301_v29, %v363_v48 }
 0x100   :  { %v417_v50 = vmul.f32 %v2305_v31, %v361_v45 }
 0x101   :  { %v453_v59 = vsel %vm449_vm6, %v419_v53, 0.0  ;;  %v110_v14 = vpop.permute.xlu2 %109 }
 0x102   :  { %v450_v55 = vsel %vm449_vm6, %v417_v50, 0.0 }
 0x107   :  { %203 = vperm.xlu2 %2076, %v186_v26   ;;  %197 = vperm.xlu1 %2075, %v186_v26   ;;  %v270_v26 = vadd.f32 %v2327_v41, %v98_v5 }
 0x109   :  { %v85_v40 = vpop.permute.xlu1 %84  ;;  %v334_v38 = vmul.f32 0.1, %v270_v26  ;;  %vm302_vm11 = vcmp.ge.f32.partialorder %v270_v26, 0.0 }
 0x10a   :  { %v268_v42 = vadd.f32 %v2322_v39, %v85_v40  ;;  %v73_v43 = vpop.permute.xlu0 %72 }
 0x10b   :  { %v266_v46 = vadd.f32 %v2327_v41, %v73_v43 }
 0x10c   :  { %vm300_vm4 = vcmp.ge.f32.partialorder %v268_v42, 0.0  ;;  %v332_v47 = vmul.f32 0.1, %v268_v42 }
 0x10d   :  { %vm298_vm5 = vcmp.ge.f32.partialorder %v266_v46, 0.0  ;;  %v330_v49 = vmul.f32 0.1, %v266_v46 }
 0x10e   :  { %v364_v51 = vsel %vm300_vm4, %v268_v42, %v332_v47 }
 0x10f   :  { %v362_v52 = vsel %vm298_vm5, %v266_v46, %v330_v49  ;;  %2079 = vset.pattern.permute.xlu2 %v2266_v21  ;;  %2078 = vset.pattern.permute.xlu1 %v2247_v13  ;;  %v420_v56 = vmul.f32 %v2330_v44, %v364_v51  ;;  %v272_v46 = vadd.f32 %v2322_v39, %v110_v14 }
 0x110   :  { %v418_v54 = vmul.f32 %v2299_v28, %v362_v52 }
 0x111   :  { %v455_v63 = vsel %vm449_vm6, %v420_v56, 0.0  ;;  %v129_v23 = vpop.permute.xlu2 %128  ;;  %vm304_vm14 = vcmp.ge.f32.partialorder %v272_v46, 0.0  ;;  %v336_v56 = vmul.f32 0.1, %v272_v46 }
 0x112   :  { %v451_v57 = vsel %vm449_vm6, %v418_v54, 0.0  ;;  %v275_v30 = vadd.f32 %v2315_v34, %v129_v23 }
 0x113   :  { %v452_v58 = vadd.f32 %v451_v57, %v450_v55 }
 0x114   :  { %v339_v40 = vmul.f32 0.1, %v275_v30  ;;  %vm307_vm12 = vcmp.ge.f32.partialorder %v275_v30, 0.0 }
 0x115   :  { %v454_v61 = vadd.f32 %v453_v59, %v452_v58 }
 0x116   :  { %v371_v48 = vsel %vm307_vm12, %v275_v30, %v339_v40 }
 0x117   :  { %222 = vperm.xlu2 %2079, %v211_v62   ;;  %216 = vperm.xlu1 %2078, %v211_v62   ;;  %v456_v0 = vadd.f32 %v455_v63, %v454_v61  ;;  %v427_v57 = vmul.f32 %v2301_v29, %v371_v48 }
 0x119   :  { %v457_v1 = vrot.slane %v456_v0, 4  ;;  %v104_v9 = vpop.permute.xlu1 %103  ;;  %v479_v5 = vsel %vm449_vm6, %v427_v57, 0.0 }
 0x11a   :  { %v117_v17 = vpop.permute.xlu0 %116  ;;  %v271_v35 = vadd.f32 %v2315_v34, %v104_v9 }
 0x11b   :  { %v458_v3 = vadd.f32 %v457_v1, %v456_v0  ;;  %v273_v20 = vadd.f32 %v2310_v33, %v117_v17 }
 0x11c   :  { %v335_v43 = vmul.f32 0.1, %v271_v35  ;;  %vm303_vm13 = vcmp.ge.f32.partialorder %v271_v35, 0.0 }
 0x11d   :  { %v459_v6 = vrot.slane %v458_v3, 2  ;;  %v337_v32 = vmul.f32 0.1, %v273_v20  ;;  %vm305_vm9 = vcmp.ge.f32.partialorder %v273_v20, 0.0 }
 0x11e   :  { %v367_v49 = vsel %vm303_vm13, %v271_v35, %v335_v43 }
 0x11f   :  { %2081 = vset.pattern.permute.xlu2 %v2268_v22  ;;  %2080 = vset.pattern.permute.xlu1 %v2245_v12  ;;  %v460_v8 = vadd.f32 %v459_v6, %v458_v3  ;;  %v369_v42 = vsel %vm305_vm9, %v273_v20, %v337_v32  ;;  %v423_v60 = vmul.f32 %v2301_v29, %v367_v49 }
 0x120   :  { %v425_v47 = vmul.f32 %v2305_v31, %v369_v42  ;;  %v368_v3 = vsel %vm304_vm14, %v272_v46, %v336_v56 }
 0x121   :  { %v461_v10 = vrot.slane %v460_v8, 1  ;;  %v142_v50 = vpop.permute.xlu2 %141  ;;  %v424_v17 = vmul.f32 %v2330_v44, %v368_v3 }
 0x122   :  { %v476_v58 = vsel %vm449_vm6, %v425_v47, 0.0  ;;  %v277_v9 = vadd.f32 %v2310_v33, %v142_v50 }
 0x123   :  { %v2349_v13 = vadd.f32 %v461_v10, %v460_v8  ;;  %v466_v8 = vsel %vm449_vm6, %v423_v60, 0.0 }
 0x124   :  { %vm309_vm1 = vcmp.ge.f32.partialorder %v277_v9, 0.0 }
 0x125   :  { %v2352_v15 = vadd.f32 %v580_v11, %v2349_v13 }
 0x127   :  { %234 = vperm.xlu2 %2081, %v211_v62   ;;  %228 = vperm.xlu1 %2080, %v211_v62   ;;  %v635_v16 = vsel %vm634_vm7, %v2352_v15, -inf }
 0x128   :  { %636 = vmax.xlane.f32.xlu0 %v635_v16 }
 0x129   :  { %v123_v18 = vpop.permute.xlu1 %122 }
 0x12a   :  { %v274_v19 = vadd.f32 %v2327_v41, %v123_v18  ;;  %v148_v59 = vpop.permute.xlu0 %147 }
 0x12b   :  { %v278_v0 = vadd.f32 %v2327_v41, %v148_v59 }
 0x12c   :  { %v338_v25 = vmul.f32 0.1, %v274_v19  ;;  %vm306_vm8 = vcmp.ge.f32.partialorder %v274_v19, 0.0 }
 0x12d   :  { %v342_v18 = vmul.f32 0.1, %v278_v0  ;;  %vm310_vm0 = vcmp.ge.f32.partialorder %v278_v0, 0.0 }
 0x12e   :  { %v370_v37 = vsel %vm306_vm8, %v274_v19, %v338_v25  ;;  %v468_v25 = vsel %vm449_vm6, %v424_v17, 0.0 }
 0x12f   :  { %2084 = vset.pattern.permute.xlu2 %v2245_v12  ;;  %2083 = vset.pattern.permute.xlu1 %v2266_v21  ;;  %v426_v45 = vmul.f32 %v2299_v28, %v370_v37  ;;  %v365_v12 = vsel %vm301_vm10, %v269_v24, %v333_v36  ;;  %v366_v21 = vsel %vm302_vm11, %v270_v26, %v334_v38  ;;  %v2393_v38 = vld [vmem:[%s3513_s1 + $0x18] sm:$0xff]  }
 0x130   :  { %v421_v53 = vmul.f32 %v2305_v31, %v365_v12  ;;  %v422_v54 = vmul.f32 %v2299_v28, %v366_v21  ;;  %v374_v26 = vsel %vm310_vm0, %v278_v0, %v342_v18  ;;  %v2035_v21 = vunpack.c.l.bf16 %v2393_v38  ;;  %v2030_v0 = vld [vmem:[%s3513_s1] sm:$0xff]   ;;  %v557_v18 = vld [vmem:[%s3513_s1 + $0xc] sm:$0xff]  }
 0x131   :  { %v477_v51 = vsel %vm449_vm6, %v426_v45, 0.0  ;;  %v160_v14 = vpop.permute.xlu2 %159  ;;  %v430_v40 = vmul.f32 %v2299_v28, %v374_v26  ;;  %v581_v26 = vunpack.c.l.bf16 %v557_v18 }
 0x132   :  { %v478_v61 = vadd.f32 %v477_v51, %v476_v58  ;;  %v464_v63 = vsel %vm449_vm6, %v422_v54, 0.0  ;;  %v463_v7 = vsel %vm449_vm6, %v421_v53, 0.0  ;;  %v280_v23 = vadd.f32 %v2322_v39, %v160_v14 }
 0x133   :  { %v465_v11 = vadd.f32 %v464_v63, %v463_v7  ;;  %v490_v49 = vsel %vm449_vm6, %v430_v40, 0.0 }
 0x134   :  { %v480_v10 = vadd.f32 %v479_v5, %v478_v61  ;;  %v344_v36 = vmul.f32 0.1, %v280_v23  ;;  %vm312_vm2 = vcmp.ge.f32.partialorder %v280_v23, 0.0 }
 0x135   :  { %v467_v20 = vadd.f32 %v466_v8, %v465_v11  ;;  %v2423_v11 = vld [vmem:[%s3513_s1 + $0x24] sm:$0xff]  }
 0x136   :  { %v376_v46 = vsel %vm312_vm2, %v280_v23, %v344_v36  ;;  %v587_v23 = vunpack.c.l.bf16 %v2423_v11 }
 0x137   :  { %253 = vperm.xlu2 %2084, %v2293_v27   ;;  %247 = vperm.xlu1 %2083, %v2293_v27   ;;  %v469_v32 = vadd.f32 %v468_v25, %v467_v20  ;;  %v432_v53 = vmul.f32 %v2330_v44, %v376_v46 }
 0x139   :  { %v135_v52 = vpop.permute.xlu1 %134  ;;  %v494_v61 = vsel %vm449_vm6, %v432_v53, 0.0 }
 0x13a   :  { %v276_v55 = vadd.f32 %v2322_v39, %v135_v52 }
 0x13c   :  { %vm308_vm15 = vcmp.ge.f32.partialorder %v276_v55, 0.0  ;;  %v340_v62 = vmul.f32 0.1, %v276_v55 }
 0x13e   :  { %v372_v1 = vsel %vm308_vm15, %v276_v55, %v340_v62 }
 0x13f   :  { %v428_v6 = vmul.f32 %v2330_v44, %v372_v1  ;;  %2085 = vset.pattern.permute.xlu1 %v2268_v22  ;;  %2087 = vset.pattern.permute.xlu2 %v2166_v4  ;;  %v341_v22 = vmul.f32 0.1, %v277_v9  ;;  %v2032_v1 = vunpack.c.h.bf16 %v2030_v0 }
 0x141   :  { %v481_v16 = vsel %vm449_vm6, %v428_v6, 0.0  ;;  %v373_v35 = vsel %vm309_vm1, %v277_v9, %v341_v22  ;;  %v173_v6 = vpop.permute.xlu2 %172 }
 0x142   :  { %v482_v19 = vadd.f32 %v481_v16, %v480_v10  ;;  %v429_v12 = vmul.f32 %v2305_v31, %v373_v35  ;;  %v2418_v10 = vadd.f32 %v2032_v1, %v2349_v13  ;;  %v282_v16 = vadd.f32 %v2327_v41, %v173_v6 }
 0x144   :  { %v483_v24 = vrot.slane %v482_v19, 4  ;;  %v489_v52 = vsel %vm449_vm6, %v429_v12, 0.0  ;;  %vm314_vm5 = vcmp.ge.f32.partialorder %v282_v16, 0.0  ;;  %v559_v12 = vld [vmem:[%s3513_s1 + $0x14] sm:$0x3] }
 0x145   :  { %v491_v56 = vadd.f32 %v490_v49, %v489_v52  ;;  %v2031_v49 = vunpack.c.l.bf16 %v2030_v0 }
 0x146   :  { %v484_v30 = vadd.f32 %v483_v24, %v482_v19  ;;  %v179_v19 = vpop.permute.xlu0 %178  ;;  %v631_v24 = vsel %vm449_vm6, %v2418_v10, -inf }
 0x147   :  { %259 = vperm.xlu1 %2085, %v2293_v27   ;;  %v470_v27 = vrot.slane %v469_v32, 4 }
 0x148   :  { %v485_v37 = vrot.slane %v484_v30, 2 }
 0x149   :  { %v154_v42 = vpop.permute.xlu1 %153  ;;  %v471_v55 = vadd.f32 %v470_v27, %v469_v32  ;;  %v346_v32 = vmul.f32 0.1, %v282_v16 }
 0x14a   :  { %v279_v43 = vadd.f32 %v2315_v34, %v154_v42  ;;  %v486_v45 = vadd.f32 %v485_v37, %v484_v30  ;;  %v283_v30 = vadd.f32 %v2315_v34, %v179_v19 }
 0x14b   :  { %v472_v62 = vrot.slane %v471_v55, 2 }
 0x14c   :  { %vm311_vm3 = vcmp.ge.f32.partialorder %v279_v43, 0.0  ;;  %v343_v47 = vmul.f32 0.1, %v279_v43  ;;  %v487_v48 = vrot.slane %v486_v45, 1  ;;  %v347_v42 = vmul.f32 0.1, %v283_v30 }
 0x14d   :  { %v473_v3 = vadd.f32 %v472_v62, %v471_v55  ;;  %vm315_vm8 = vcmp.ge.f32.partialorder %v283_v30, 0.0  ;;  %v562_v62 = vld [vmem:[%s3513_s1 + $0x20] sm:$0x3] }
 0x14e   :  { %v375_v50 = vsel %vm311_vm3, %v279_v43, %v343_v47  ;;  %v2400_v51 = vadd.f32 %v487_v48, %v486_v45  ;;  %v378_v43 = vsel %vm314_vm5, %v282_v16, %v346_v32  ;;  %v583_v47 = vunpack.c.l.bf16 %v559_v12  ;;  %v210_v16 = vpop.permute.xlu0 %209 }
 0x14f   :  { %v431_v54 = vmul.f32 %v2301_v29, %v375_v50  ;;  %2086 = vset.pattern.permute.xlu1 %v2166_v4  ;;  %v474_v14 = vrot.slane %v473_v3, 1  ;;  %v434_v27 = vmul.f32 %v2299_v28, %v378_v43  ;;  %v379_v48 = vsel %vm315_vm8, %v283_v30, %v347_v42 }
 0x150   :  { %v2407_v57 = vadd.f32 %v2035_v21, %v2400_v51  ;;  %v435_v55 = vmul.f32 %v2301_v29, %v379_v48 }
 0x151   :  { %v492_v58 = vsel %vm449_vm6, %v431_v54, 0.0  ;;  %v475_v25 = vadd.f32 %v474_v14, %v473_v3  ;;  %v192_v50 = vpop.permute.xlu2 %191  ;;  %v586_v3 = vunpack.c.l.bf16 %v562_v62 }
 0x152   :  { %v493_v59 = vadd.f32 %v492_v58, %v491_v56  ;;  %v647_v60 = vsel %vm449_vm6, %v2407_v57, -inf  ;;  %v503_v56 = vsel %vm449_vm6, %v434_v27, 0.0  ;;  %v505_v0 = vsel %vm449_vm6, %v435_v55, 0.0 }
 0x153   :  { %648 = vmax.xlane.f32.xlu0 %v647_v60  ;;  %v2438_v40 = vadd.f32 %v581_v26, %v475_v25  ;;  %v2453_v58 = vadd.f32 %v583_v47, %v475_v25 }
 0x154   :  { %v495_v63 = vadd.f32 %v494_v61, %v493_v59  ;;  %v2456_v61 = vadd.f32 %v2031_v49, %v2349_v13  ;;  %v582_v13 = vunpack.c.h.bf16 %v557_v18  ;;  %v565_v18 = vld [vmem:[%s3513_s1 + $0x2c] sm:$0x3] }
 0x155   :  { %v638_v46 = vsel %vm449_vm6, %v2438_v40, -inf  ;;  %v644_v1 = vsel %vm634_vm7, %v2453_v58, -inf  ;;  %v589_v32 = vunpack.c.l.bf16 %v565_v18 }
 0x156   :  { %v496_v4 = vrot.slane %v495_v63, 4  ;;  %v628_v6 = vsel %vm449_vm6, %v2456_v61, -inf }
 0x158   :  { %v497_v5 = vadd.f32 %v496_v4, %v495_v63 }
 0x159   :  { %v167_v7 = vpop.permute.xlu1 %166 }
 0x15a   :  { %v281_v8 = vadd.f32 %v2310_v33, %v167_v7  ;;  %v498_v9 = vrot.slane %v497_v5, 2 }
 0x15c   :  { %v499_v17 = vadd.f32 %v498_v9, %v497_v5  ;;  %v345_v20 = vmul.f32 0.1, %v281_v8  ;;  %vm313_vm4 = vcmp.ge.f32.partialorder %v281_v8, 0.0  ;;  %v285_v9 = vadd.f32 %v2310_v33, %v192_v50 }
 0x15e   :  { %v500_v22 = vrot.slane %v499_v17, 1  ;;  %v377_v36 = vsel %vm313_vm4, %v281_v8, %v345_v20  ;;  %vm317_vm10 = vcmp.ge.f32.partialorder %v285_v9, 0.0 }
 0x15f   :  { %v433_v21 = vmul.f32 %v2305_v31, %v377_v36  ;;  %v2036_v36 = vunpack.c.h.bf16 %v2393_v38 }
 0x160   :  { %632 = vmax.xlane.f32.xlu2 %v631_v24  ;;  %v2433_v35 = vadd.f32 %v500_v22, %v499_v17  ;;  %v2470_v17 = vadd.f32 %v586_v3, %v2400_v51  ;;  %v2473_v22 = vadd.f32 %v582_v13, %v475_v25  ;;  %v349_v24 = vmul.f32 0.1, %v285_v9 }
 0x161   :  { %v502_v52 = vsel %vm449_vm6, %v433_v21, 0.0  ;;  %v204_v7 = vpop.permute.xlu2 %203  ;;  %v2492_v48 = vadd.f32 %v2036_v36, %v2400_v51  ;;  %v588_v3 = vunpack.c.h.bf16 %v2423_v11 }
 0x162   :  { %v2436_v37 = vadd.f32 %v587_v23, %v2433_v35  ;;  %v504_v59 = vadd.f32 %v503_v56, %v502_v52  ;;  %v287_v19 = vadd.f32 %v2315_v34, %v204_v7  ;;  %v288_v23 = vadd.f32 %v2322_v39, %v210_v16 }
 0x163   :  { %v653_v30 = vsel %vm634_vm7, %v2470_v17, -inf  ;;  %v641_v25 = vsel %vm449_vm6, %v2473_v22, -inf  ;;  %v381_v27 = vsel %vm317_vm10, %v285_v9, %v349_v24  ;;  %v2489_v38 = vadd.f32 %v589_v32, %v2433_v35 }
 0x164   :  { %v656_v45 = vsel %vm449_vm6, %v2436_v37, -inf  ;;  %v506_v5 = vadd.f32 %v505_v0, %v504_v59  ;;  %v351_v42 = vmul.f32 0.1, %v287_v19  ;;  %vm319_vm11 = vcmp.ge.f32.partialorder %v287_v19, 0.0 }
 0x165   :  { %657 = vmax.xlane.f32.xlu0 %v656_v45  ;;  %v2046_v45 = vld [vmem:[%s3513_s1 + $0x30] sm:$0xff]   ;;  %v352_v21 = vmul.f32 0.1, %v288_v23  ;;  %vm320_vm12 = vcmp.ge.f32.partialorder %v288_v23, 0.0  ;;  %v437_v55 = vmul.f32 %v2305_v31, %v381_v27  ;;  %v662_v51 = vsel %vm634_vm7, %v2489_v38, -inf }
 0x166   :  { %v2039_v49 = vunpack.c.l.bf16 %v2046_v45  ;;  %v383_v50 = vsel %vm319_vm11, %v287_v19, %v351_v42  ;;  %v2516_v19 = vadd.f32 %v588_v3, %v2433_v35  ;;  %v2040_v24 = vunpack.c.h.bf16 %v2046_v45 }
 0x167   :  { %v384_v56 = vsel %vm320_vm12, %v288_v23, %v352_v21  ;;  %v439_v62 = vmul.f32 %v2301_v29, %v383_v50 }
 0x168   :  { %639 = vmax.xlane.f32.xlu2 %v638_v46  ;;  %v659_v23 = vsel %vm449_vm6, %v2516_v19, -inf }
 0x169   :  { %v185_v53 = vpop.permute.xlu1 %184  ;;  %v518_v9 = vsel %vm449_vm6, %v439_v62, 0.0 }
 0x16a   :  { %v284_v54 = vadd.f32 %v2322_v39, %v185_v53 }
 0x16c   :  { %vm316_vm9 = vcmp.ge.f32.partialorder %v284_v54, 0.0  ;;  %v348_v60 = vmul.f32 0.1, %v284_v54 }
 0x16e   :  { %v380_v63 = vsel %vm316_vm9, %v284_v54, %v348_v60  ;;  %v568_v54 = vld [vmem:[%s3513_s1 + $0x38] sm:$0x3] }
 0x16f   :  { %v436_v4 = vmul.f32 %v2330_v44, %v380_v63  ;;  %v592_v0 = vunpack.c.l.bf16 %v568_v54 }
 0x170   :  { %645 = vmax.xlane.f32.xlu2 %v644_v1 }
 0x171   :  { %v507_v8 = vsel %vm449_vm6, %v436_v4, 0.0  ;;  %629 = vmax.xlane.f32.xlu1 %v628_v6  ;;  %v650_v4 = vsel %vm449_vm6, %v2492_v48, -inf  ;;  %v515_v6 = vsel %vm449_vm6, %v437_v55, 0.0 }
 0x172   :  { %v508_v14 = vadd.f32 %v507_v8, %v506_v5  ;;  %v440_v5 = vmul.f32 %v2330_v44, %v384_v56 }
 0x174   :  { %v509_v20 = vrot.slane %v508_v14, 4  ;;  %v520_v11 = vsel %vm449_vm6, %v440_v5, 0.0 }
 0x176   :  { %v510_v26 = vadd.f32 %v509_v20, %v508_v14 }
 0x178   :  { %654 = vmax.xlane.f32.xlu2 %v653_v30  ;;  %v511_v43 = vrot.slane %v510_v26, 2  ;;  %v223_v30 = vpop.permute.xlu2 %222 }
 0x179   :  { %v198_v12 = vpop.permute.xlu1 %197  ;;  %642 = vmax.xlane.f32.xlu1 %v641_v25  ;;  %v571_v25 = vld [vmem:[%s3513_s1 + $0x44] sm:$0x3]  ;;  %v290_v45 = vadd.f32 %v2327_v41, %v223_v30 }
 0x17a   :  { %v286_v46 = vadd.f32 %v2327_v41, %v198_v12  ;;  %v512_v47 = vadd.f32 %v511_v43, %v510_v26  ;;  %v569_v43 = vld [vmem:[%s3513_s1 + $0x3c] sm:$0xff]  }
 0x17b   :  { %v354_v55 = vmul.f32 0.1, %v290_v45  ;;  %vm322_vm15 = vcmp.ge.f32.partialorder %v290_v45, 0.0 }
 0x17c   :  { %vm318_vm13 = vcmp.ge.f32.partialorder %v286_v46, 0.0  ;;  %v350_v52 = vmul.f32 0.1, %v286_v46  ;;  %v513_v53 = vrot.slane %v512_v47, 1 }
 0x17e   :  { %v382_v59 = vsel %vm318_vm13, %v286_v46, %v350_v52  ;;  %v514_v60 = vadd.f32 %v513_v53, %v512_v47  ;;  %v595_v47 = vunpack.c.l.bf16 %v571_v25  ;;  %v594_v52 = vunpack.c.h.bf16 %v569_v43 }
 0x17f   :  { %v438_v63 = vmul.f32 %v2299_v28, %v382_v59 }
 0x180   :  { %663 = vmax.xlane.f32.xlu2 %v662_v51  ;;  %v2504_v1 = vadd.f32 %v2039_v49, %v514_v60  ;;  %v2513_v14 = vadd.f32 %v592_v0, %v514_v60  ;;  %v2523_v42 = vadd.f32 %v2040_v24, %v514_v60  ;;  %v593_v49 = vunpack.c.l.bf16 %v569_v43  ;;  %v242_v43 = vpop.permute.xlu0 %241 }
 0x181   :  { %v516_v13 = vsel %vm449_vm6, %v438_v63, 0.0  ;;  %651 = vmax.xlane.f32.xlu1 %v650_v4  ;;  %v235_v50 = vpop.permute.xlu2 %234  ;;  %v386_v4 = vsel %vm322_vm15, %v290_v45, %v354_v55 }
 0x182   :  { %v517_v7 = vadd.f32 %v516_v13, %v515_v6  ;;  %v665_v8 = vsel %vm449_vm6, %v2504_v1, -inf  ;;  %v671_v18 = vsel %vm634_vm7, %v2513_v14, -inf  ;;  %v668_v27 = vsel %vm449_vm6, %v2523_v42, -inf }
 0x183   :  { %666 = vmax.xlane.f32.xlu0 %v665_v8  ;;  %v292_v56 = vadd.f32 %v2322_v39, %v235_v50  ;;  %v442_v8 = vmul.f32 %v2299_v28, %v386_v4 }
 0x184   :  { %v519_v16 = vadd.f32 %v518_v9, %v517_v7 }
 0x185   :  { %v356_v3 = vmul.f32 0.1, %v292_v56  ;;  %vm324_vm0 = vcmp.ge.f32.partialorder %v292_v56, 0.0 }
 0x186   :  { %v521_v20 = vadd.f32 %v520_v11, %v519_v16 }
 0x187   :  { %v388_v9 = vsel %vm324_vm0, %v292_v56, %v356_v3 }
 0x188   :  { %672 = vmax.xlane.f32.xlu2 %v671_v18  ;;  %v522_v26 = vrot.slane %v521_v20, 4  ;;  %v529_v18 = vsel %vm449_vm6, %v442_v8, 0.0 }
 0x189   :  { %660 = vmax.xlane.f32.xlu1 %v659_v23  ;;  %v217_v36 = vpop.permute.xlu1 %216  ;;  %v444_v23 = vmul.f32 %v2330_v44, %v388_v9 }
 0x18a   :  { %v523_v32 = vadd.f32 %v522_v26, %v521_v20  ;;  %v289_v12 = vadd.f32 %v2310_v33, %v217_v36 }
 0x18b   :  { %v533_v36 = vsel %vm449_vm6, %v444_v23, 0.0 }
 0x18c   :  { %v524_v35 = vrot.slane %v523_v32, 2  ;;  %v353_v53 = vmul.f32 0.1, %v289_v12  ;;  %vm321_vm14 = vcmp.ge.f32.partialorder %v289_v12, 0.0 }
 0x18e   :  { %v525_v21 = vadd.f32 %v524_v35, %v523_v32  ;;  %v385_v63 = vsel %vm321_vm14, %v289_v12, %v353_v53 }
 0x18f   :  { %v441_v6 = vmul.f32 %v2305_v31, %v385_v63 }
 0x190   :  { %v526_v46 = vrot.slane %v525_v21, 1 }
 0x191   :  { %669 = vmax.xlane.f32.xlu1 %v668_v27  ;;  %v528_v11 = vsel %vm449_vm6, %v441_v6, 0.0 }
 0x192   :  { %v527_v54 = vadd.f32 %v526_v46, %v525_v21  ;;  %v530_v26 = vadd.f32 %v529_v18, %v528_v11  ;;  %v574_v46 = vld [vmem:[%s3513_s1 + $0x50] sm:$0x3] }
 0x193   :  { %v598_v53 = vunpack.c.l.bf16 %v574_v46 }
 0x194   :  { %v2536_v59 = vadd.f32 %v595_v47, %v527_v54  ;;  %v2538_v60 = vadd.f32 %v593_v49, %v527_v54  ;;  %v2540_v62 = vadd.f32 %v594_v52, %v527_v54  ;;  %v293_v47 = vadd.f32 %v2310_v33, %v242_v43  ;;  %v2047_v49 = vld [vmem:[%s3513_s1 + $0x48] sm:$0xff]   ;;  %v254_v52 = vpop.permute.xlu2 %253 }
 0x195   :  { %v2044_v56 = vunpack.c.h.bf16 %v2047_v49  ;;  %v2043_v63 = vunpack.c.l.bf16 %v2047_v49 }
 0x196   :  { %v680_v51 = vsel %vm634_vm7, %v2536_v59, -inf  ;;  %v674_v0 = vsel %vm449_vm6, %v2538_v60, -inf  ;;  %v677_v5 = vsel %vm449_vm6, %v2540_v62, -inf  ;;  %vm325_vm3 = vcmp.ge.f32.partialorder %v293_v47, 0.0 }
 0x197   :  { %681 = vmax.xlane.f32.xlu2 %v680_v51  ;;  %675 = vmax.xlane.f32.xlu0 %v674_v0  ;;  %v357_v51 = vmul.f32 0.1, %v293_v47 }
 0x199   :  { %v229_v13 = vpop.permute.xlu1 %228  ;;  %678 = vmax.xlane.f32.xlu1 %v677_v5  ;;  %v389_v6 = vsel %vm325_vm3, %v293_v47, %v357_v51  ;;  %v2594_v47 = vand.u32 127, %v62_v2 }
 0x19a   :  { %v291_v7 = vadd.f32 %v2315_v34, %v229_v13 }
 0x19c   :  { %vm323_vm1 = vcmp.ge.f32.partialorder %v291_v7, 0.0  ;;  %v355_v16 = vmul.f32 0.1, %v291_v7 }
 0x19e   :  { %v387_v20 = vsel %vm323_vm1, %v291_v7, %v355_v16  ;;  %v445_v16 = vmul.f32 %v2305_v31, %v389_v6 }
 0x19f   :  { %v443_v24 = vmul.f32 %v2301_v29, %v387_v20 }
 0x1a1   :  { %v531_v30 = vsel %vm449_vm6, %v443_v24, 0.0  ;;  %v541_v24 = vsel %vm449_vm6, %v445_v16, 0.0 }
 0x1a2   :  { %v532_v32 = vadd.f32 %v531_v30, %v530_v26 }
 0x1a4   :  { %v534_v35 = vadd.f32 %v533_v36, %v532_v32 }
 0x1a6   :  { %v535_v25 = vrot.slane %v534_v35, 4 }
 0x1a8   :  { %v536_v12 = vadd.f32 %v535_v25, %v534_v35 }
 0x1a9   :  { %v248_v21 = vpop.permute.xlu1 %247 }
 0x1aa   :  { %v294_v45 = vadd.f32 %v2327_v41, %v248_v21  ;;  %v537_v27 = vrot.slane %v536_v12, 2  ;;  %v295_v41 = vadd.f32 %v2315_v34, %v254_v52 }
 0x1ac   :  { %v538_v50 = vadd.f32 %v537_v27, %v536_v12  ;;  %v358_v54 = vmul.f32 0.1, %v294_v45  ;;  %vm326_vm2 = vcmp.ge.f32.partialorder %v294_v45, 0.0  ;;  %v359_v13 = vmul.f32 0.1, %v295_v41  ;;  %v576_v27 = vld [vmem:[%s3513_s1 + $0x54] sm:$0xff]  }
 0x1ad   :  { %vm327_vm4 = vcmp.ge.f32.partialorder %v295_v41, 0.0  ;;  %v599_v52 = vunpack.c.l.bf16 %v576_v27 }
 0x1ae   :  { %v539_v55 = vrot.slane %v538_v50, 1  ;;  %v390_v4 = vsel %vm326_vm2, %v294_v45, %v358_v54  ;;  %v391_v11 = vsel %vm327_vm4, %v295_v41, %v359_v13  ;;  %v637_v45 = vpop.xlane.xlu0 %636 }
 0x1af   :  { %v446_v34 = vmul.f32 %v2299_v28, %v390_v4  ;;  %v447_v26 = vmul.f32 %v2301_v29, %v391_v11  ;;  %v577_v29 = vld [vmem:[%s3513_s1 + $0x5c] sm:$0x3]  ;;  %vm703_vm8 = vcmp.ge.f32.partialorder %v2352_v15, %v637_v45 }
 0x1b0   :  { %v540_v0 = vadd.f32 %v539_v55, %v538_v50  ;;  %v601_v49 = vunpack.c.l.bf16 %v577_v29  ;;  %v600_v50 = vunpack.c.h.bf16 %v576_v27  ;;  %v727_v54 = vsel %vm703_vm8, %v2594_v47, 64 }
 0x1b1   :  { %v542_v20 = vsel %vm449_vm6, %v446_v34, 0.0  ;;  %v544_v28 = vsel %vm449_vm6, %v447_v26, 0.0  ;;  %v2611_v41 = vsel %vm634_vm7, %v727_v54, 2147483647 }
 0x1b2   :  { %v2566_v3 = vadd.f32 %v598_v53, %v540_v0  ;;  %v2568_v33 = vadd.f32 %v2044_v56, %v540_v0  ;;  %v2570_v5 = vadd.f32 %v2043_v63, %v540_v0  ;;  %v543_v30 = vadd.f32 %v542_v20, %v541_v24 }
 0x1b3   :  { %v781_v6 = vshra.s32 %v2611_v41, 16 }
 0x1b4   :  { %v689_v7 = vsel %vm634_vm7, %v2566_v3, -inf  ;;  %v686_v8 = vsel %vm449_vm6, %v2568_v33, -inf  ;;  %v683_v9 = vsel %vm449_vm6, %v2570_v5, -inf  ;;  %v545_v25 = vadd.f32 %v544_v28, %v543_v30 }
 0x1b5   :  { %690 = vmax.xlane.f32.xlu2 %v689_v7  ;;  %687 = vmax.xlane.f32.xlu1 %v686_v8 }
 0x1b6   :  { %684 = vmax.xlane.f32.xlu0 %v683_v9  ;;  %v2622_v9 = vcvt.s32.f32 %v781_v6 }
 0x1b9   :  { %v260_v18 = vpop.permute.xlu1 %259 }
 0x1ba   :  { %v296_v23 = vadd.f32 %v2322_v39, %v260_v18 }
 0x1bc   :  { %vm328_vm5 = vcmp.ge.f32.partialorder %v296_v23, 0.0  ;;  %v360_v32 = vmul.f32 0.1, %v296_v23 }
 0x1be   :  { %v392_v36 = vsel %vm328_vm5, %v296_v23, %v360_v32 }
 0x1bf   :  { %v448_v35 = vmul.f32 %v2330_v44, %v392_v36 }
 0x1c1   :  { %v546_v31 = vsel %vm449_vm6, %v448_v35, 0.0 }
 0x1c2   :  { %v547_v43 = vadd.f32 %v546_v31, %v545_v25 }
 0x1c4   :  { %v548_v12 = vrot.slane %v547_v43, 4 }
 0x1c6   :  { %v549_v21 = vadd.f32 %v548_v12, %v547_v43 }
 0x1c8   :  { %v550_v39 = vrot.slane %v549_v21, 2 }
 0x1ca   :  { %v551_v46 = vadd.f32 %v550_v39, %v549_v21 }
 0x1cc   :  { %v552_v44 = vrot.slane %v551_v46, 1 }
 0x1ce   :  { %v553_v53 = vadd.f32 %v552_v44, %v551_v46 }
 0x1d0   :  { %v2598_v55 = vadd.f32 %v601_v49, %v553_v53  ;;  %v2600_v56 = vadd.f32 %v600_v50, %v553_v53  ;;  %v2602_v63 = vadd.f32 %v599_v52, %v553_v53 }
 0x1d2   :  { %v698_v51 = vsel %vm634_vm7, %v2598_v55, -inf  ;;  %v695_v2 = vsel %vm449_vm6, %v2600_v56, -inf  ;;  %v692_v15 = vsel %vm449_vm6, %v2602_v63, -inf }
 0x1d3   :  { %v633_v0 = vpop.xlane.xlu2 %632  ;;  %699 = vmax.xlane.f32.xlu2 %v698_v51  ;;  %696 = vmax.xlane.f32.xlu1 %v695_v2 }
 0x1d4   :  { %vm702_vm9 = vcmp.ge.f32.partialorder %v2418_v10, %v633_v0  ;;  %693 = vmax.xlane.f32.xlu0 %v692_v15 }
 0x1d5   :  { %v726_v4 = vsel %vm702_vm9, %v2594_v47, 64 }
 0x1d6   :  { %v2617_v13 = vsel %vm449_vm6, %v726_v4, 2147483647 }
 0x1d7   :  { %v766_v7 = vshra.s32 %v2617_v13, 16 }
 0x1d9   :  { %v2620_v8 = vcvt.s32.f32 %v766_v7 }
 0x1db   :  { %v640_v34 = vpop.xlane.xlu2 %639  ;;  %769 = vmin.xlane.f32.xlu2 %v2620_v8  ;;  %784 = vmin.xlane.f32.xlu1 %v2622_v9 }
 0x1dc   :  { %vm704_vm11 = vcmp.ge.f32.partialorder %v2438_v40, %v640_v34  ;;  %v649_v40 = vpop.xlane.xlu0 %648 }
 0x1dd   :  { %v728_v26 = vsel %vm704_vm11, %v2594_v47, 64  ;;  %vm707_vm14 = vcmp.ge.f32.partialorder %v2407_v57, %v649_v40 }
 0x1de   :  { %v2646_v36 = vsel %vm449_vm6, %v728_v26, 2147483647  ;;  %v731_v21 = vsel %vm707_vm14, %v2594_v47, 64 }
 0x1df   :  { %v796_v43 = vshra.s32 %v2646_v36, 16  ;;  %v2672_v46 = vsel %vm449_vm6, %v731_v21, 2147483647 }
 0x1e0   :  { %v841_v53 = vshra.s32 %v2672_v46, 16 }
 0x1e1   :  { %v2668_v29 = vcvt.s32.f32 %v796_v43 }
 0x1e2   :  { %v2695_v0 = vcvt.s32.f32 %v841_v53 }
 0x1e3   :  { %v646_v10 = vpop.xlane.xlu2 %645 }
 0x1e4   :  { %vm706_vm10 = vcmp.ge.f32.partialorder %v2453_v58, %v646_v10  ;;  %v630_v16 = vpop.xlane.xlu1 %629  ;;  %v658_v39 = vpop.xlane.xlu0 %657 }
 0x1e5   :  { %v730_v11 = vsel %vm706_vm10, %v2594_v47, 64  ;;  %vm701_vm12 = vcmp.ge.f32.partialorder %v2456_v61, %v630_v16  ;;  %vm710_vm1 = vcmp.ge.f32.partialorder %v2436_v37, %v658_v39 }
 0x1e6   :  { %v2631_v20 = vsel %vm634_vm7, %v730_v11, 2147483647  ;;  %v725_v18 = vsel %vm701_vm12, %v2594_v47, 64  ;;  %v734_v51 = vsel %vm710_vm1, %v2594_v47, 64 }
 0x1e7   :  { %v2635_v23 = vsel %vm449_vm6, %v725_v18, 2147483647  ;;  %v826_v24 = vshra.s32 %v2631_v20, 16  ;;  %v2698_v4 = vsel %vm449_vm6, %v734_v51, 2147483647 }
 0x1e8   :  { %v751_v58 = vshra.s32 %v2635_v23, 16  ;;  %v886_v11 = vshra.s32 %v2698_v4, 16 }
 0x1e9   :  { %v2640_v30 = vcvt.s32.f32 %v826_v24 }
 0x1ea   :  { %v2642_v32 = vcvt.s32.f32 %v751_v58 }
 0x1eb   :  { %v655_v61 = vpop.xlane.xlu2 %654  ;;  %829 = vmin.xlane.f32.xlu1 %v2640_v30 }
 0x1ec   :  { %vm709_vm13 = vcmp.ge.f32.partialorder %v2470_v17, %v655_v61  ;;  %v643_v28 = vpop.xlane.xlu1 %642  ;;  %754 = vmin.xlane.f32.xlu0 %v2642_v32 }
 0x1ed   :  { %v733_v35 = vsel %vm709_vm13, %v2594_v47, 64  ;;  %vm705_vm15 = vcmp.ge.f32.partialorder %v2473_v22, %v643_v28 }
 0x1ee   :  { %v2654_v25 = vsel %vm634_vm7, %v733_v35, 2147483647  ;;  %v729_v31 = vsel %vm705_vm15, %v2594_v47, 64 }
 0x1ef   :  { %v2659_v12 = vsel %vm449_vm6, %v729_v31, 2147483647  ;;  %v871_v17 = vshra.s32 %v2654_v25, 16 }
 0x1f0   :  { %v811_v57 = vshra.s32 %v2659_v12, 16 }
 0x1f1   :  { %v2664_v45 = vcvt.s32.f32 %v871_v17 }
 0x1f2   :  { %v2666_v22 = vcvt.s32.f32 %v811_v57 }
 0x1f3   :  { %v664_v27 = vpop.xlane.xlu2 %663  ;;  %874 = vmin.xlane.f32.xlu1 %v2664_v45 }
 0x1f4   :  { %vm712_vm0 = vcmp.ge.f32.partialorder %v2489_v38, %v664_v27  ;;  %v652_v44 = vpop.xlane.xlu1 %651  ;;  %814 = vmin.xlane.f32.xlu2 %v2666_v22  ;;  %799 = vmin.xlane.f32.xlu0 %v2668_v29 }
 0x1f5   :  { %v736_v49 = vsel %vm712_vm0, %v2594_v47, 64  ;;  %vm708_vm2 = vcmp.ge.f32.partialorder %v2492_v48, %v652_v44 }
 0x1f6   :  { %v2681_v50 = vsel %vm634_vm7, %v736_v49, 2147483647  ;;  %v732_v52 = vsel %vm708_vm2, %v2594_v47, 64  ;;  %v667_v15 = vpop.xlane.xlu0 %666 }
 0x1f7   :  { %v2686_v38 = vsel %vm449_vm6, %v732_v52, 2147483647  ;;  %v916_v54 = vshra.s32 %v2681_v50, 16  ;;  %vm713_vm4 = vcmp.ge.f32.partialorder %v2504_v1, %v667_v15 }
 0x1f8   :  { %v856_v37 = vshra.s32 %v2686_v38, 16  ;;  %v737_v24 = vsel %vm713_vm4, %v2594_v47, 64 }
 0x1f9   :  { %v2691_v2 = vcvt.s32.f32 %v916_v54  ;;  %v2725_v40 = vsel %vm449_vm6, %v737_v24, 2147483647 }
 0x1fa   :  { %v2693_v48 = vcvt.s32.f32 %v856_v37  ;;  %v931_v35 = vshra.s32 %v2725_v40, 16 }
 0x1fb   :  { %v673_v6 = vpop.xlane.xlu2 %672  ;;  %919 = vmin.xlane.f32.xlu1 %v2691_v2 }
 0x1fc   :  { %vm715_vm3 = vcmp.ge.f32.partialorder %v2513_v14, %v673_v6  ;;  %v661_v7 = vpop.xlane.xlu1 %660  ;;  %859 = vmin.xlane.f32.xlu0 %v2693_v48  ;;  %844 = vmin.xlane.f32.xlu2 %v2695_v0  ;;  %v2739_v39 = vcvt.s32.f32 %v931_v35 }
 0x1fd   :  { %v739_v34 = vsel %vm715_vm3, %v2594_v47, 64  ;;  %vm711_vm5 = vcmp.ge.f32.partialorder %v2516_v19, %v661_v7  ;;  %v2722_v19 = vcvt.s32.f32 %v886_v11 }
 0x1fe   :  { %v2708_v10 = vsel %vm634_vm7, %v739_v34, 2147483647  ;;  %v735_v16 = vsel %vm711_vm5, %v2594_v47, 64 }
 0x1ff   :  { %v2713_v14 = vsel %vm449_vm6, %v735_v16, 2147483647  ;;  %v961_v18 = vshra.s32 %v2708_v10, 16 }
 0x200   :  { %v901_v1 = vshra.s32 %v2713_v14, 16 }
 0x201   :  { %v2718_v26 = vcvt.s32.f32 %v961_v18 }
 0x202   :  { %v2720_v58 = vcvt.s32.f32 %v901_v1 }
 0x203   :  { %964 = vmin.xlane.f32.xlu1 %v2718_v26 }
 0x204   :  { %v670_v61 = vpop.xlane.xlu1 %669  ;;  %904 = vmin.xlane.f32.xlu0 %v2720_v58  ;;  %889 = vmin.xlane.f32.xlu2 %v2722_v19 }
 0x205   :  { %vm714_vm8 = vcmp.ge.f32.partialorder %v2523_v42, %v670_v61 }
 0x206   :  { %v738_v28 = vsel %vm714_vm8, %v2594_v47, 64 }
 0x207   :  { %v2734_v31 = vsel %vm449_vm6, %v738_v28, 2147483647 }
 0x208   :  { %v946_v43 = vshra.s32 %v2734_v31, 16 }
 0x20a   :  { %v682_v17 = vpop.xlane.xlu2 %681  ;;  %v676_v21 = vpop.xlane.xlu0 %675  ;;  %v2737_v57 = vcvt.s32.f32 %v946_v43 }
 0x20b   :  { %vm718_vm9 = vcmp.ge.f32.partialorder %v2536_v59, %v682_v17  ;;  %vm716_vm10 = vcmp.ge.f32.partialorder %v2538_v60, %v676_v21 }
 0x20c   :  { %v742_v42 = vsel %vm718_vm9, %v2594_v47, 64  ;;  %v740_v27 = vsel %vm716_vm10, %v2594_v47, 64  ;;  %v679_v44 = vpop.xlane.xlu1 %678  ;;  %949 = vmin.xlane.f32.xlu0 %v2737_v57  ;;  %934 = vmin.xlane.f32.xlu2 %v2739_v39 }
 0x20d   :  { %v2748_v49 = vsel %vm634_vm7, %v742_v42, 2147483647  ;;  %v2751_v52 = vsel %vm449_vm6, %v740_v27, 2147483647  ;;  %vm717_vm11 = vcmp.ge.f32.partialorder %v2540_v62, %v679_v44 }
 0x20e   :  { %v741_v59 = vsel %vm717_vm11, %v2594_v47, 64  ;;  %v1006_v60 = vshra.s32 %v2748_v49, 16  ;;  %v976_v53 = vshra.s32 %v2751_v52, 16 }
 0x20f   :  { %v2758_v54 = vsel %vm449_vm6, %v741_v59, 2147483647 }
 0x210   :  { %v2760_v51 = vcvt.s32.f32 %v1006_v60  ;;  %v991_v37 = vshra.s32 %v2758_v54, 16  ;;  %v2766_v6 = vcvt.s32.f32 %v976_v53 }
 0x212   :  { %1009 = vmin.xlane.f32.xlu1 %v2760_v51  ;;  %v2764_v15 = vcvt.s32.f32 %v991_v37 }
 0x214   :  { %994 = vmin.xlane.f32.xlu0 %v2764_v15  ;;  %979 = vmin.xlane.f32.xlu2 %v2766_v6 }
 0x228   :  { %v691_v62 = vpop.xlane.xlu2 %690  ;;  %v688_v7 = vpop.xlane.xlu1 %687 }
 0x229   :  { %vm721_vm12 = vcmp.ge.f32.partialorder %v2566_v3, %v691_v62  ;;  %vm720_vm13 = vcmp.ge.f32.partialorder %v2568_v33, %v688_v7  ;;  %v685_v34 = vpop.xlane.xlu0 %684 }
 0x22a   :  { %v745_v16 = vsel %vm721_vm12, %v2594_v47, 64  ;;  %v744_v11 = vsel %vm720_vm13, %v2594_v47, 64  ;;  %vm719_vm14 = vcmp.ge.f32.partialorder %v2570_v5, %v685_v34 }
 0x22b   :  { %v2776_v18 = vsel %vm634_vm7, %v745_v16, 2147483647  ;;  %v2779_v24 = vsel %vm449_vm6, %v744_v11, 2147483647  ;;  %v743_v1 = vsel %vm719_vm14, %v2594_v47, 64  ;;  %v765_v11 = vand.u32 65535, %v2617_v13 }
 0x22c   :  { %v2783_v61 = vsel %vm449_vm6, %v743_v1, 2147483647  ;;  %v1036_v3 = vshra.s32 %v2779_v24, 16  ;;  %v1051_v33 = vshra.s32 %v2776_v18, 16  ;;  %v750_v13 = vand.u32 65535, %v2635_v23 }
 0x22d   :  { %v1021_v28 = vshra.s32 %v2783_v61, 16  ;;  %v810_v23 = vand.u32 65535, %v2659_v12 }
 0x22e   :  { %v2788_v35 = vcvt.s32.f32 %v1036_v3  ;;  %v2790_v5 = vcvt.s32.f32 %v1051_v33  ;;  %v780_v3 = vand.u32 65535, %v2611_v41  ;;  %v767_v33 = vcvt.s32.f32 %v765_v11 }
 0x22f   :  { %v2792_v43 = vcvt.s32.f32 %v1021_v28 }
 0x230   :  { %1039 = vmin.xlane.f32.xlu0 %v2788_v35  ;;  %1054 = vmin.xlane.f32.xlu1 %v2790_v5  ;;  %v782_v28 = vcvt.s32.f32 %v780_v3 }
 0x231   :  { %1024 = vmin.xlane.f32.xlu2 %v2792_v43 }
 0x246   :  { %v700_v17 = vpop.xlane.xlu2 %699  ;;  %v697_v21 = vpop.xlane.xlu1 %696 }
 0x247   :  { %vm724_vm15 = vcmp.ge.f32.partialorder %v2598_v55, %v700_v17  ;;  %vm723_vm0 = vcmp.ge.f32.partialorder %v2600_v56, %v697_v21  ;;  %v694_v42 = vpop.xlane.xlu0 %693 }
 0x248   :  { %v748_v27 = vsel %vm724_vm15, %v2594_v47, 64  ;;  %v747_v44 = vsel %vm723_vm0, %v2594_v47, 64  ;;  %vm722_vm1 = vcmp.ge.f32.partialorder %v2602_v63, %v694_v42  ;;  %v825_v42 = vand.u32 65535, %v2631_v20 }
 0x249   :  { %v2803_v59 = vsel %vm634_vm7, %v748_v27, 2147483647  ;;  %v2806_v60 = vsel %vm449_vm6, %v747_v44, 2147483647  ;;  %v746_v53 = vsel %vm722_vm1, %v2594_v47, 64  ;;  %v870_v20 = vand.u32 65535, %v2654_v25 }
 0x24a   :  { %v2810_v37 = vsel %vm449_vm6, %v746_v53, 2147483647  ;;  %v1081_v55 = vshra.s32 %v2806_v60, 16  ;;  %v1096_v56 = vshra.s32 %v2803_v59, 16  ;;  %v827_v44 = vcvt.s32.f32 %v825_v42 }
 0x24b   :  { %v1066_v62 = vshra.s32 %v2810_v37, 16 }
 0x24c   :  { %v2815_v7 = vcvt.s32.f32 %v1081_v55  ;;  %v2817_v63 = vcvt.s32.f32 %v1096_v56  ;;  %v795_v55 = vand.u32 65535, %v2646_v36 }
 0x24d   :  { %v2819_v34 = vcvt.s32.f32 %v1066_v62  ;;  %v872_v62 = vcvt.s32.f32 %v870_v20 }
 0x24e   :  { %1084 = vmin.xlane.f32.xlu0 %v2815_v7  ;;  %1099 = vmin.xlane.f32.xlu1 %v2817_v63  ;;  %v2823_v16 = vpop.xlane.xlu2 %769  ;;  %v2827_v1 = vpop.xlane.xlu1 %784  ;;  %v797_v25 = vcvt.s32.f32 %v795_v55  ;;  %v930_v55 = vand.u32 65535, %v2725_v40  ;;  %v975_v40 = vand.u32 65535, %v2751_v52 }
 0x24f   :  { %1069 = vmin.xlane.f32.xlu2 %v2819_v34  ;;  %vm771_vm2 = vcmp.eq.f32.partialorder %v2620_v8, %v2823_v16  ;;  %vm786_vm3 = vcmp.eq.f32.partialorder %v2622_v9, %v2827_v1  ;;  %v752_v8 = vcvt.s32.f32 %v750_v13 }
 0x250   :  { %v772_v17 = vsel %vm771_vm2, %v767_v33, inf  ;;  %v787_v21 = vsel %vm786_vm3, %v782_v28, inf  ;;  %v915_v33 = vand.u32 65535, %v2681_v50  ;;  %v840_v28 = vand.u32 65535, %v2672_v46 }
 0x256   :  { %773 = vmin.xlane.f32.xlu0 %v772_v17 }
 0x257   :  { %788 = vmin.xlane.f32.xlu2 %v787_v21  ;;  %v917_v21 = vcvt.s32.f32 %v915_v33 }
 0x25e   :  { %v2836_v27 = vpop.xlane.xlu1 %829 }
 0x25f   :  { %v2838_v41 = vpop.xlane.xlu0 %754  ;;  %vm831_vm4 = vcmp.eq.f32.partialorder %v2640_v30, %v2836_v27 }
 0x260   :  { %v832_v53 = vsel %vm831_vm4, %v827_v44, inf  ;;  %vm756_vm5 = vcmp.eq.f32.partialorder %v2642_v32, %v2838_v41  ;;  %v812_v32 = vcvt.s32.f32 %v810_v23  ;;  %v960_v44 = vand.u32 65535, %v2708_v10 }
 0x261   :  { %833 = vmin.xlane.f32.xlu2 %v832_v53  ;;  %v757_v9 = vsel %vm756_vm5, %v752_v8, inf  ;;  %v885_v8 = vand.u32 65535, %v2698_v4 }
 0x262   :  { %758 = vmin.xlane.f32.xlu1 %v757_v9  ;;  %v962_v9 = vcvt.s32.f32 %v960_v44 }
 0x266   :  { %v2847_v56 = vpop.xlane.xlu1 %874 }
 0x267   :  { %v2849_v11 = vpop.xlane.xlu2 %814  ;;  %v2851_v30 = vpop.xlane.xlu0 %799  ;;  %vm876_vm8 = vcmp.eq.f32.partialorder %v2664_v45, %v2847_v56  ;;  %v855_v45 = vand.u32 65535, %v2686_v38 }
 0x268   :  { %v877_v3 = vsel %vm876_vm8, %v872_v62, inf  ;;  %vm816_vm9 = vcmp.eq.f32.partialorder %v2666_v22, %v2849_v11  ;;  %vm801_vm10 = vcmp.eq.f32.partialorder %v2668_v29, %v2851_v30  ;;  %v842_v29 = vcvt.s32.f32 %v840_v28 }
 0x269   :  { %878 = vmin.xlane.f32.xlu2 %v877_v3  ;;  %v817_v12 = vsel %vm816_vm9, %v812_v32, inf  ;;  %v802_v36 = vsel %vm801_vm10, %v797_v25, inf  ;;  %v857_v50 = vcvt.s32.f32 %v855_v45  ;;  %v945_v62 = vand.u32 65535, %v2734_v31 }
 0x26a   :  { %818 = vmin.xlane.f32.xlu0 %v817_v12  ;;  %803 = vmin.xlane.f32.xlu1 %v802_v36  ;;  %v932_v3 = vcvt.s32.f32 %v930_v55  ;;  %v1005_v12 = vand.u32 65535, %v2748_v49  ;;  %v990_v31 = vand.u32 65535, %v2758_v54  ;;  %v977_v45 = vcvt.s32.f32 %v975_v40 }
 0x26b   :  { %v947_v25 = vcvt.s32.f32 %v945_v62  ;;  %v2167_v40 = vmov 0.0  }
 0x26c   :  { %v1007_v33 = vcvt.s32.f32 %v1005_v12  ;;  %v992_v49 = vcvt.s32.f32 %v990_v31  ;;  %v761_v31 = vcvt.f32.s32 %v2838_v41  ;;  %v836_v41 = vcvt.f32.s32 %v2836_v27 }
 0x26e   :  { %v2862_v17 = vpop.xlane.xlu1 %919 }
 0x26f   :  { %v2864_v42 = vpop.xlane.xlu2 %844  ;;  %v2866_v22 = vpop.xlane.xlu0 %859  ;;  %vm921_vm11 = vcmp.eq.f32.partialorder %v2691_v2, %v2862_v17  ;;  %v900_v2 = vand.u32 65535, %v2713_v14 }
 0x270   :  { %v922_v13 = vsel %vm921_vm11, %v917_v21, inf  ;;  %vm846_vm12 = vcmp.eq.f32.partialorder %v2695_v0, %v2864_v42  ;;  %vm861_vm13 = vcmp.eq.f32.partialorder %v2693_v48, %v2866_v22  ;;  %v887_v48 = vcvt.s32.f32 %v885_v8 }
 0x271   :  { %923 = vmin.xlane.f32.xlu2 %v922_v13  ;;  %v847_v46 = vsel %vm846_vm12, %v842_v29, inf  ;;  %v862_v38 = vsel %vm861_vm13, %v857_v50, inf  ;;  %v902_v10 = vcvt.s32.f32 %v900_v2  ;;  %v1035_v21 = vand.u32 65535, %v2779_v24 }
 0x272   :  { %848 = vmin.xlane.f32.xlu0 %v847_v46  ;;  %863 = vmin.xlane.f32.xlu1 %v862_v38  ;;  %v1020_v29 = vand.u32 65535, %v2783_v61  ;;  %v1095_v61 = vand.u32 65535, %v2803_v59  ;;  %v1080_v8 = vand.u32 65535, %v2806_v60  ;;  %v1065_v2 = vand.u32 65535, %v2810_v37 }
 0x274   :  { %v1022_v44 = vcvt.s32.f32 %v1020_v29  ;;  %v821_v29 = vcvt.f32.s32 %v2849_v11 }
 0x276   :  { %v2877_v53 = vpop.xlane.xlu1 %964 }
 0x277   :  { %v2879_v20 = vpop.xlane.xlu2 %889  ;;  %v2881_v0 = vpop.xlane.xlu0 %904  ;;  %vm966_vm14 = vcmp.eq.f32.partialorder %v2718_v26, %v2877_v53 }
 0x278   :  { %v967_v23 = vsel %vm966_vm14, %v962_v9, inf  ;;  %vm891_vm15 = vcmp.eq.f32.partialorder %v2722_v19, %v2879_v20  ;;  %vm906_vm0 = vcmp.eq.f32.partialorder %v2720_v58, %v2881_v0 }
 0x279   :  { %968 = vmin.xlane.f32.xlu2 %v967_v23  ;;  %v892_v4 = vsel %vm891_vm15, %v887_v48, inf  ;;  %v907_v14 = vsel %vm906_vm0, %v902_v10, inf  ;;  %v1082_v48 = vcvt.s32.f32 %v1080_v8  ;;  %v776_v10 = vcvt.f32.s32 %v2823_v16 }
 0x27a   :  { %893 = vmin.xlane.f32.xlu0 %v892_v4  ;;  %908 = vmin.xlane.f32.xlu1 %v907_v14  ;;  %v1206_v4 = vpop.f32.mrf.mxu1  ;;  %v791_v14 = vcvt.f32.s32 %v2827_v1 }
 0x27b   :  { %v777_v62 = vshll.u32 %v776_v10, 16  ;;  %v851_v10 = vcvt.f32.s32 %v2864_v42 }
 0x27f   :  { %v2891_v32 = vpop.xlane.xlu2 %934  ;;  %v2893_v26 = vpop.xlane.xlu0 %949 }
 0x280   :  { %vm936_vm1 = vcmp.eq.f32.partialorder %v2739_v39, %v2891_v32  ;;  %vm951_vm2 = vcmp.eq.f32.partialorder %v2737_v57, %v2893_v26 }
 0x281   :  { %v937_v58 = vsel %vm936_vm1, %v932_v3, inf  ;;  %v952_v19 = vsel %vm951_vm2, %v947_v25, inf  ;;  %v792_v25 = vshll.u32 %v791_v14, 16  ;;  %v881_v14 = vcvt.f32.s32 %v2847_v56 }
 0x282   :  { %938 = vmin.xlane.f32.xlu0 %v937_v58  ;;  %953 = vmin.xlane.f32.xlu1 %v952_v19 }
 0x285   :  { %v2902_v36 = vpop.xlane.xlu1 %1009 }
 0x286   :  { %vm1011_vm3 = vcmp.eq.f32.partialorder %v2760_v51, %v2902_v36  ;;  %v1050_v51 = vand.u32 65535, %v2776_v18 }
 0x287   :  { %v2906_v39 = vpop.xlane.xlu2 %979  ;;  %v2908_v28 = vpop.xlane.xlu0 %994  ;;  %v1012_v57 = vsel %vm1011_vm3, %v1007_v33, inf }
 0x288   :  { %1013 = vmin.xlane.f32.xlu2 %v1012_v57  ;;  %vm981_vm4 = vcmp.eq.f32.partialorder %v2766_v6, %v2906_v39  ;;  %vm996_vm5 = vcmp.eq.f32.partialorder %v2764_v15, %v2908_v28  ;;  %v1052_v46 = vcvt.s32.f32 %v1050_v51  ;;  %v1037_v6 = vcvt.s32.f32 %v1035_v21 }
 0x289   :  { %v982_v52 = vsel %vm981_vm4, %v977_v45, inf  ;;  %v997_v54 = vsel %vm996_vm5, %v992_v49, inf }
 0x28a   :  { %983 = vmin.xlane.f32.xlu0 %v982_v52  ;;  %998 = vmin.xlane.f32.xlu1 %v997_v54  ;;  %v762_v52 = vshll.u32 %v761_v31, 16 }
 0x2a3   :  { %v2917_v13 = vpop.xlane.xlu1 %1054  ;;  %v2919_v50 = vpop.xlane.xlu0 %1039 }
 0x2a4   :  { %v2921_v38 = vpop.xlane.xlu2 %1024  ;;  %vm1056_vm8 = vcmp.eq.f32.partialorder %v2790_v5, %v2917_v13  ;;  %vm1041_vm9 = vcmp.eq.f32.partialorder %v2788_v35, %v2919_v50  ;;  %v1097_v35 = vcvt.s32.f32 %v1095_v61  ;;  %v822_v61 = vshll.u32 %v821_v29, 16 }
 0x2a5   :  { %vm1026_vm10 = vcmp.eq.f32.partialorder %v2792_v43, %v2921_v38  ;;  %v1057_v15 = vsel %vm1056_vm8, %v1052_v46, inf  ;;  %v1042_v18 = vsel %vm1041_vm9, %v1037_v6, inf  ;;  %v1067_v43 = vcvt.s32.f32 %v1065_v2 }
 0x2a6   :  { %v1027_v24 = vsel %vm1026_vm10, %v1022_v44, inf  ;;  %1058 = vmin.xlane.f32.xlu2 %v1057_v15  ;;  %1043 = vmin.xlane.f32.xlu1 %v1042_v18  ;;  %v806_v6 = vcvt.f32.s32 %v2851_v30  ;;  %v926_v29 = vcvt.f32.s32 %v2862_v17 }
 0x2a7   :  { %1028 = vmin.xlane.f32.xlu0 %v1027_v24 }
 0x2a8   :  { %v807_v27 = vshll.u32 %v806_v6, 16  ;;  %v911_v6 = vcvt.f32.s32 %v2881_v0 }
 0x2c1   :  { %v2932_v9 = vpop.xlane.xlu1 %1099  ;;  %v2934_v5 = vpop.xlane.xlu0 %1084 }
 0x2c2   :  { %v2936_v23 = vpop.xlane.xlu2 %1069  ;;  %vm1101_vm11 = vcmp.eq.f32.partialorder %v2817_v63, %v2932_v9  ;;  %vm1086_vm12 = vcmp.eq.f32.partialorder %v2815_v7, %v2934_v5  ;;  %v2946_v63 = vmul.f32 0.17677669, %v1206_v4 }
 0x2c3   :  { %v1102_v59 = vsel %vm1101_vm11, %v1097_v35, inf  ;;  %vm1071_vm13 = vcmp.eq.f32.partialorder %v2819_v34, %v2936_v23  ;;  %v1087_v60 = vsel %vm1086_vm12, %v1082_v48, inf }
 0x2c4   :  { %1103 = vmin.xlane.f32.xlu2 %v1102_v59  ;;  %v1072_v37 = vsel %vm1071_vm13, %v1067_v43, inf  ;;  %1088 = vmin.xlane.f32.xlu1 %v1087_v60  ;;  %v1218_v12 = vperm.slane %v2946_v63, 0  ;;  %v1211_v48 = vrot.slane %v2946_v63, 1  ;;  %v837_v43 = vshll.u32 %v836_v41, 16 }
 0x2c5   :  { %1073 = vmin.xlane.f32.xlu0 %v1072_v37  ;;  %v1213_v0 = vrot.slane %v2946_v63, 3 }
 0x2c6   :  { %v1219_v4 = vperm.slane %v1211_v48, 0 }
 0x2c9   :  { %v774_v55 = vpop.xlane.xlu0 %773 }
 0x2ca   :  { %v789_v3 = vpop.xlane.xlu2 %788  ;;  %v775_v7 = vcvt.f32.s32 %v774_v55  ;;  %v866_v55 = vcvt.f32.s32 %v2866_v22 }
 0x2cb   :  { %v790_v58 = vcvt.f32.s32 %v789_v3 }
 0x2cc   :  { %v778_v19 = vadd.s32 %v777_v62, %v775_v7  ;;  %v867_v31 = vshll.u32 %v866_v55, 16  ;;  %v971_v55 = vcvt.f32.s32 %v2877_v53 }
 0x2cd   :  { %v793_v34 = vadd.s32 %v792_v25, %v790_v58 }
 0x2ce   :  { %vm1110_vm14 = vcmp.eq.s32.totalorder %v2594_v47, %v778_v19  ;;  %v852_v19 = vshll.u32 %v851_v10, 16 }
 0x2cf   :  { %v2951_v16 = vsel %vm1110_vm14, 1.0, %v2167_v40  ;;  %vm1111_vm15 = vcmp.eq.s32.totalorder %v2594_v47, %v793_v34 }
 0x2d0   :  { %v1235_v1 = vmul.f32 %v2951_v16, %v1218_v12  ;;  %v2958_v57 = vsel %vm1111_vm15, 1.0, %v2167_v40 }
 0x2d1   :  { %v1236_v51 = vmul.f32 %v2958_v57, %v1218_v12 }
 0x2d2   :  { %v1261_v33 = vsel %vm449_vm6, %v1235_v1, 0.0  ;;  %v882_v1 = vshll.u32 %v881_v14, 16 }
 0x2d3   :  { %1262 = vadd.xlane.f32.xlu1 %v1261_v33  ;;  %v1264_v46 = vsel %vm634_vm7, %v1236_v51, 0.0 }
 0x2d4   :  { %v834_v45 = vpop.xlane.xlu2 %833 }
 0x2d5   :  { %v759_v49 = vpop.xlane.xlu1 %758  ;;  %v835_v18 = vcvt.f32.s32 %v834_v45 }
 0x2d6   :  { %v760_v54 = vcvt.f32.s32 %v759_v49 }
 0x2d7   :  { %v838_v60 = vadd.s32 %v837_v43, %v835_v18 }
 0x2d8   :  { %v763_v21 = vadd.s32 %v762_v52, %v760_v54 }
 0x2d9   :  { %vm1114_vm3 = vcmp.eq.s32.totalorder %v2594_v47, %v838_v60 }
 0x2da   :  { %vm1109_vm0 = vcmp.eq.s32.totalorder %v2594_v47, %v763_v21  ;;  %v2990_v54 = vsel %vm1114_vm3, 1.0, %v2167_v40 }
 0x2db   :  { %1265 = vadd.xlane.f32.xlu1 %v1264_v46  ;;  %v2967_v44 = vsel %vm1109_vm0, 1.0, %v2167_v40  ;;  %v896_v46 = vcvt.f32.s32 %v2879_v20 }
 0x2dc   :  { %v1234_v15 = vmul.f32 %v2967_v44, %v1218_v12  ;;  %v879_v8 = vpop.xlane.xlu2 %878  ;;  %v1212_v12 = vrot.slane %v2946_v63, 2 }
 0x2dd   :  { %v819_v24 = vpop.xlane.xlu0 %818  ;;  %v804_v2 = vpop.xlane.xlu1 %803  ;;  %v880_v25 = vcvt.f32.s32 %v879_v8 }
 0x2de   :  { %v820_v11 = vcvt.f32.s32 %v819_v24  ;;  %v1258_v35 = vsel %vm449_vm6, %v1234_v15, 0.0  ;;  %v805_v59 = vcvt.f32.s32 %v804_v2  ;;  %v1220_v41 = vperm.slane %v1212_v12, 0 }
 0x2df   :  { %1259 = vadd.xlane.f32.xlu0 %v1258_v35  ;;  %v883_v51 = vadd.s32 %v882_v1, %v880_v25  ;;  %v1239_v15 = vmul.f32 %v2990_v54, %v1219_v4  ;;  %v927_v2 = vshll.u32 %v926_v29, 16  ;;  %v972_v1 = vshll.u32 %v971_v55, 16 }
 0x2e0   :  { %v823_v30 = vadd.s32 %v822_v61, %v820_v11  ;;  %v808_v37 = vadd.s32 %v807_v27, %v805_v59  ;;  %v897_v11 = vshll.u32 %v896_v46, 16  ;;  %v912_v27 = vshll.u32 %v911_v6, 16 }
 0x2e1   :  { %vm1117_vm8 = vcmp.eq.s32.totalorder %v2594_v47, %v883_v51 }
 0x2e2   :  { %vm1113_vm1 = vcmp.eq.s32.totalorder %v2594_v47, %v823_v30  ;;  %vm1112_vm2 = vcmp.eq.s32.totalorder %v2594_v47, %v808_v37  ;;  %v1273_v30 = vsel %vm634_vm7, %v1239_v15, 0.0  ;;  %v3012_v10 = vsel %vm1117_vm8, 1.0, %v2167_v40 }
 0x2e3   :  { %v2978_v62 = vsel %vm1113_vm1, 1.0, %v2167_v40  ;;  %v2981_v3 = vsel %vm1112_vm2, 1.0, %v2167_v40  ;;  %3541 = vst [vmem:[#allocation7_spill] sm:$0xff] %v3012_v10 }
 0x2e4   :  { %v1238_v7 = vmul.f32 %v2978_v62, %v1219_v4  ;;  %v1237_v42 = vmul.f32 %v2981_v3, %v1219_v4  ;;  %v924_v49 = vpop.xlane.xlu2 %923 }
 0x2e5   :  { %v849_v58 = vpop.xlane.xlu0 %848  ;;  %v864_v56 = vpop.xlane.xlu1 %863  ;;  %v925_v17 = vcvt.f32.s32 %v924_v49 }
 0x2e6   :  { %v850_v34 = vcvt.f32.s32 %v849_v58  ;;  %v1270_v22 = vsel %vm449_vm6, %v1238_v7, 0.0  ;;  %v865_v33 = vcvt.f32.s32 %v864_v56  ;;  %v1267_v45 = vsel %vm449_vm6, %v1237_v42, 0.0 }
 0x2e7   :  { %1271 = vadd.xlane.f32.xlu0 %v1270_v22  ;;  %1268 = vadd.xlane.f32.xlu2 %v1267_v45  ;;  %v928_v4 = vadd.s32 %v927_v2, %v925_v17  ;;  %v941_v7 = vcvt.f32.s32 %v2891_v32  ;;  %v1221_v58 = vperm.slane %v1213_v0, 0  ;;  %v956_v42 = vcvt.f32.s32 %v2893_v26 }
 0x2e8   :  { %v853_v52 = vadd.s32 %v852_v19, %v850_v34  ;;  %v868_v21 = vadd.s32 %v867_v31, %v865_v33  ;;  %v1242_v19 = vmul.f32 %v3012_v10, %v1220_v41  ;;  %v1214_v26 = vrot.slane %v2946_v63, 4 }
 0x2e9   :  { %vm1120_vm11 = vcmp.eq.s32.totalorder %v2594_v47, %v928_v4  ;;  %v942_v31 = vshll.u32 %v941_v7, 16  ;;  %v986_v17 = vcvt.f32.s32 %v2906_v39 }
 0x2ea   :  { %vm1115_vm4 = vcmp.eq.s32.totalorder %v2594_v47, %v853_v52  ;;  %vm1116_vm5 = vcmp.eq.s32.totalorder %v2594_v47, %v868_v21  ;;  %v957_v52 = vshll.u32 %v956_v42, 16  ;;  %v1282_v21 = vsel %vm634_vm7, %v1242_v19, 0.0 }
 0x2eb   :  { %v2999_v18 = vsel %vm1115_vm4, 1.0, %v2167_v40  ;;  %v3002_v24 = vsel %vm1116_vm5, 1.0, %v2167_v40 }
 0x2ec   :  { %3539 = vst [vmem:[#allocation5_spill] sm:$0xff] %v2999_v18  ;;  %v1240_v61 = vmul.f32 %v2999_v18, %v1220_v41  ;;  %v1241_v20 = vmul.f32 %v3002_v24, %v1220_v41  ;;  %v969_v25 = vpop.xlane.xlu2 %968  ;;  %v3034_v41 = vsel %vm1120_vm11, 1.0, %v2167_v40  ;;  %vm1361_vm11 = vcmask 195712  }
 0x2ed   :  { %3540 = vst [vmem:[#allocation6_spill] sm:$0xff] %v3002_v24  ;;  %v894_v8 = vpop.xlane.xlu0 %893  ;;  %v909_v35 = vpop.xlane.xlu1 %908  ;;  %v970_v22 = vcvt.f32.s32 %v969_v25  ;;  %v1245_v2 = vmul.f32 %v3034_v41, %v1221_v58 }
 0x2ee   :  { %v895_v48 = vcvt.f32.s32 %v894_v8  ;;  %v1276_v43 = vsel %vm449_vm6, %v1240_v61, 0.0  ;;  %v910_v59 = vcvt.f32.s32 %v909_v35  ;;  %v1279_v60 = vsel %vm449_vm6, %v1241_v20, 0.0  ;;  %3544 = vst [vmem:[#allocation10_spill] sm:$0xff] %v3034_v41 }
 0x2ef   :  { %1277 = vadd.xlane.f32.xlu0 %v1276_v43  ;;  %1274 = vadd.xlane.f32.xlu2 %v1273_v30  ;;  %v973_v6 = vadd.s32 %v972_v1, %v970_v22  ;;  %v1016_v61 = vcvt.f32.s32 %v2902_v36  ;;  %v1222_v8 = vperm.slane %v1214_v26, 0  ;;  %v1001_v20 = vcvt.f32.s32 %v2908_v28 }
 0x2f0   :  { %v898_v37 = vadd.s32 %v897_v11, %v895_v48  ;;  %1280 = vadd.xlane.f32.xlu1 %v1279_v60  ;;  %v913_v14 = vadd.s32 %v912_v27, %v910_v59  ;;  %v1215_v28 = vrot.slane %v2946_v63, 5  ;;  %v987_v59 = vshll.u32 %v986_v17, 16 }
 0x2f1   :  { %vm1123_vm14 = vcmp.eq.s32.totalorder %v2594_v47, %v973_v6  ;;  %v1017_v27 = vshll.u32 %v1016_v61, 16  ;;  %v1002_v4 = vshll.u32 %v1001_v20, 16  ;;  %v1291_v55 = vsel %vm634_vm7, %v1245_v2, 0.0 }
 0x2f2   :  { %vm1118_vm9 = vcmp.eq.s32.totalorder %v2594_v47, %v898_v37  ;;  %vm1119_vm10 = vcmp.eq.s32.totalorder %v2594_v47, %v913_v14  ;;  %v1216_v61 = vrot.slane %v2946_v63, 6 }
 0x2f3   :  { %v3021_v56 = vsel %vm1118_vm9, 1.0, %v2167_v40  ;;  %v3024_v34 = vsel %vm1119_vm10, 1.0, %v2167_v40  ;;  %vm1357_vm10 = vcmask 130112  }
 0x2f4   :  { %3542 = vst [vmem:[#allocation8_spill] sm:$0xff] %v3021_v56  ;;  %v1243_v53 = vmul.f32 %v3021_v56, %v1221_v58  ;;  %v1244_v12 = vmul.f32 %v3024_v34, %v1221_v58  ;;  %v3056_v58 = vsel %vm1123_vm14, 1.0, %v2167_v40  ;;  %vm1402_vm14 = vcmask 1043459  }
 0x2f5   :  { %3543 = vst [vmem:[#allocation9_spill] sm:$0xff] %v3024_v34  ;;  %v939_v32 = vpop.xlane.xlu0 %938  ;;  %v954_v33 = vpop.xlane.xlu1 %953  ;;  %v1248_v22 = vmul.f32 %v3056_v58, %v1222_v8 }
 0x2f6   :  { %v940_v45 = vcvt.f32.s32 %v939_v32  ;;  %v1285_v49 = vsel %vm449_vm6, %v1243_v53, 0.0  ;;  %v955_v51 = vcvt.f32.s32 %v954_v33  ;;  %v1288_v29 = vsel %vm449_vm6, %v1244_v12, 0.0  ;;  %3547 = vst [vmem:[#allocation13_spill] sm:$0xff] %v3056_v58 }
 0x2f7   :  { %1286 = vadd.xlane.f32.xlu0 %v1285_v49  ;;  %1283 = vadd.xlane.f32.xlu2 %v1282_v21  ;;  %v1223_v53 = vperm.slane %v1215_v28, 0  ;;  %v1300_v33 = vsel %vm634_vm7, %v1248_v22, 0.0  ;;  %v1061_v21 = vcvt.f32.s32 %v2917_v13  ;;  %v1224_v13 = vperm.slane %v1216_v61, 0 }
 0x2f8   :  { %v943_v46 = vadd.s32 %v942_v31, %v940_v45  ;;  %1289 = vadd.xlane.f32.xlu1 %v1288_v29  ;;  %v958_v15 = vadd.s32 %v957_v52, %v955_v51  ;;  %v1046_v29 = vcvt.f32.s32 %v2919_v50 }
 0x2f9   :  { %v1062_v17 = vshll.u32 %v1061_v21, 16 }
 0x2fa   :  { %vm1121_vm12 = vcmp.eq.s32.totalorder %v2594_v47, %v943_v46  ;;  %vm1122_vm13 = vcmp.eq.s32.totalorder %v2594_v47, %v958_v15  ;;  %v1031_v46 = vcvt.f32.s32 %v2921_v38 }
 0x2fb   :  { %v1014_v0 = vpop.xlane.xlu2 %1013  ;;  %v3043_v11 = vsel %vm1121_vm12, 1.0, %v2167_v40  ;;  %v3046_v35 = vsel %vm1122_vm13, 1.0, %v2167_v40  ;;  %vm1398_vm12 = vcmask 1041409   ;;  %vm1400_vm13 = vcmask 1042434  }
 0x2fc   :  { %3545 = vst [vmem:[#allocation11_spill] sm:$0xff] %v3043_v11  ;;  %v1246_v36 = vmul.f32 %v3043_v11, %v1222_v8  ;;  %v1015_v48 = vcvt.f32.s32 %v1014_v0  ;;  %v1247_v43 = vmul.f32 %v3046_v35, %v1222_v8  ;;  %v1047_v8 = vshll.u32 %v1046_v29, 16 }
 0x2fd   :  { %3546 = vst [vmem:[#allocation12_spill] sm:$0xff] %v3046_v35  ;;  %v984_v39 = vpop.xlane.xlu0 %983  ;;  %v999_v30 = vpop.xlane.xlu1 %998 }
 0x2fe   :  { %v985_v60 = vcvt.f32.s32 %v984_v39  ;;  %v1294_v37 = vsel %vm449_vm6, %v1246_v36, 0.0  ;;  %v1000_v14 = vcvt.f32.s32 %v999_v30  ;;  %v1297_v7 = vsel %vm449_vm6, %v1247_v43, 0.0 }
 0x2ff   :  { %1295 = vadd.xlane.f32.xlu0 %v1294_v37  ;;  %1292 = vadd.xlane.f32.xlu2 %v1291_v55  ;;  %v1018_v42 = vadd.s32 %v1017_v27, %v1015_v48  ;;  %v1032_v36 = vshll.u32 %v1031_v46, 16  ;;  %v1106_v55 = vcvt.f32.s32 %v2932_v9 }
 0x300   :  { %v988_v25 = vadd.s32 %v987_v59, %v985_v60  ;;  %1298 = vadd.xlane.f32.xlu1 %v1297_v7  ;;  %v1003_v19 = vadd.s32 %v1002_v4, %v1000_v14  ;;  %v1091_v7 = vcvt.f32.s32 %v2934_v5 }
 0x301   :  { %vm1126_vm1 = vcmp.eq.s32.totalorder %v2594_v47, %v1018_v42  ;;  %v1107_v22 = vshll.u32 %v1106_v55, 16 }
 0x302   :  { %vm1124_vm15 = vcmp.eq.s32.totalorder %v2594_v47, %v988_v25  ;;  %vm1125_vm0 = vcmp.eq.s32.totalorder %v2594_v47, %v1003_v19  ;;  %v3074_v49 = vsel %vm1126_vm1, 1.0, %v2167_v40  ;;  %v1076_v25 = vcvt.f32.s32 %v2936_v23 }
 0x303   :  { %v3062_v32 = vsel %vm1124_vm15, 1.0, %v2167_v40  ;;  %v3065_v12 = vsel %vm1125_vm0, 1.0, %v2167_v40  ;;  %3550 = vst [vmem:[#allocation16_spill] sm:$0xff] %v3074_v49  ;;  %v1251_v52 = vmul.f32 %v3074_v49, %v1223_v53  ;;  %vm1404_vm15 = vcmask 1044484  }
 0x304   :  { %3548 = vst [vmem:[#allocation14_spill] sm:$0xff] %v3062_v32  ;;  %v1249_v26 = vmul.f32 %v3062_v32, %v1223_v53  ;;  %v1250_v1 = vmul.f32 %v3065_v12, %v1223_v53  ;;  %v1217_v53 = vrot.slane %v2946_v63, 7  ;;  %vm1406_vm0 = vcmask 1045509  }
 0x305   :  { %3549 = vst [vmem:[#allocation15_spill] sm:$0xff] %v3065_v12  ;;  %v1309_v51 = vsel %vm634_vm7, %v1251_v52, 0.0  ;;  %vm1408_vm1 = vcmask 1046534  }
 0x306   :  { %v1303_v31 = vsel %vm449_vm6, %v1249_v26, 0.0  ;;  %v1306_v45 = vsel %vm449_vm6, %v1250_v1, 0.0  ;;  %v1092_v26 = vshll.u32 %v1091_v7, 16  ;;  %v1225_v9 = vperm.slane %v1217_v53, 0 }
 0x307   :  { %1304 = vadd.xlane.f32.xlu0 %v1303_v31  ;;  %1301 = vadd.xlane.f32.xlu2 %v1300_v33 }
 0x308   :  { %1307 = vadd.xlane.f32.xlu1 %v1306_v45  ;;  %v1077_v45 = vshll.u32 %v1076_v25, 16  ;;  %v3159_v25 = vadd.s32 4294967288, %v2594_v47 }
 0x30f   :  { %1310 = vadd.xlane.f32.xlu2 %v1309_v51 }
 0x319   :  { %v1059_v6 = vpop.xlane.xlu2 %1058  ;;  %v1044_v15 = vpop.xlane.xlu1 %1043 }
 0x31a   :  { %v1060_v20 = vcvt.f32.s32 %v1059_v6  ;;  %v1045_v0 = vcvt.f32.s32 %v1044_v15  ;;  %v1029_v2 = vpop.xlane.xlu0 %1028 }
 0x31b   :  { %v1030_v48 = vcvt.f32.s32 %v1029_v2 }
 0x31c   :  { %v1063_v39 = vadd.s32 %v1062_v17, %v1060_v20  ;;  %v1048_v43 = vadd.s32 %v1047_v8, %v1045_v0 }
 0x31d   :  { %v1033_v28 = vadd.s32 %v1032_v36, %v1030_v48 }
 0x31e   :  { %vm1129_vm2 = vcmp.eq.s32.totalorder %v2594_v47, %v1063_v39  ;;  %vm1128_vm3 = vcmp.eq.s32.totalorder %v2594_v47, %v1048_v43 }
 0x31f   :  { %v3085_v50 = vsel %vm1129_vm2, 1.0, %v2167_v40  ;;  %v3088_v38 = vsel %vm1128_vm3, 1.0, %v2167_v40  ;;  %vm1127_vm4 = vcmp.eq.s32.totalorder %v2594_v47, %v1033_v28  ;;  %vm1410_vm2 = vcmask 1047559  }
 0x320   :  { %3551 = vst [vmem:[#allocation17_spill] sm:$0xff] %v3085_v50  ;;  %v1254_v27 = vmul.f32 %v3085_v50, %v1224_v13  ;;  %v1253_v59 = vmul.f32 %v3088_v38, %v1224_v13  ;;  %v3094_v30 = vsel %vm1127_vm4, 1.0, %v2167_v40  ;;  %vm1413_vm3 = vcmask 162816  }
 0x321   :  { %3552 = vst [vmem:[#allocation18_spill] sm:$0xff] %v3088_v38  ;;  %v1252_v60 = vmul.f32 %v3094_v30, %v1224_v13 }
 0x322   :  { %3553 = vst [vmem:[#allocation19_spill] sm:$0xff] %v3094_v30  ;;  %v1318_v37 = vsel %vm634_vm7, %v1254_v27, 0.0  ;;  %v1315_v4 = vsel %vm449_vm6, %v1253_v59, 0.0 }
 0x323   :  { %1319 = vadd.xlane.f32.xlu2 %v1318_v37  ;;  %1316 = vadd.xlane.f32.xlu1 %v1315_v4  ;;  %v1312_v14 = vsel %vm449_vm6, %v1252_v60, 0.0 }
 0x324   :  { %1313 = vadd.xlane.f32.xlu0 %v1312_v14 }
 0x337   :  { %v1104_v42 = vpop.xlane.xlu2 %1103  ;;  %v1089_v19 = vpop.xlane.xlu1 %1088 }
 0x338   :  { %v1105_v1 = vcvt.f32.s32 %v1104_v42  ;;  %v1090_v31 = vcvt.f32.s32 %v1089_v19  ;;  %v1074_v33 = vpop.xlane.xlu0 %1073  ;;  %v3162_v42 = vadd.s32 4294967280, %v2594_v47 }
 0x339   :  { %v1075_v52 = vcvt.f32.s32 %v1074_v33 }
 0x33a   :  { %v1108_v51 = vadd.s32 %v1107_v22, %v1105_v1  ;;  %v1093_v21 = vadd.s32 %v1092_v26, %v1090_v31 }
 0x33b   :  { %v1078_v29 = vadd.s32 %v1077_v45, %v1075_v52 }
 0x33c   :  { %vm1132_vm5 = vcmp.eq.s32.totalorder %v2594_v47, %v1108_v51  ;;  %vm1131_vm8 = vcmp.eq.s32.totalorder %v2594_v47, %v1093_v21 }
 0x33d   :  { %v3107_v5 = vsel %vm1132_vm5, 1.0, %v2167_v40  ;;  %v3110_v23 = vsel %vm1131_vm8, 1.0, %v2167_v40  ;;  %vm1130_vm9 = vcmp.eq.s32.totalorder %v2594_v47, %v1078_v29 }
 0x33e   :  { %3554 = vst [vmem:[#allocation20_spill] sm:$0xff] %v3107_v5  ;;  %v1257_v63 = vmul.f32 %v3107_v5, %v1225_v9  ;;  %v1256_v46 = vmul.f32 %v3110_v23, %v1225_v9  ;;  %v3116_v6 = vsel %vm1130_vm9, 1.0, %v2167_v40 }
 0x33f   :  { %3555 = vst [vmem:[#allocation21_spill] sm:$0xff] %v3110_v23  ;;  %v1255_v15 = vmul.f32 %v3116_v6, %v1225_v9 }
 0x340   :  { %3556 = vst [vmem:[#allocation22_spill] sm:$0xff] %v3116_v6  ;;  %v1327_v61 = vsel %vm634_vm7, %v1257_v63, 0.0  ;;  %v1324_v17 = vsel %vm449_vm6, %v1256_v46, 0.0 }
 0x341   :  { %1328 = vadd.xlane.f32.xlu2 %v1327_v61  ;;  %1325 = vadd.xlane.f32.xlu1 %v1324_v17  ;;  %v1321_v8 = vsel %vm449_vm6, %v1255_v15, 0.0 }
 0x342   :  { %1322 = vadd.xlane.f32.xlu0 %v1321_v8 }
 0x346   :  { %v3126_v2 = vpop.xlane.xlu1 %1262 }
 0x347   :  { %v1356_v53 = vperm.slane %v3126_v2, %v3159_v25 }
 0x34e   :  { %v3132_v48 = vpop.xlane.xlu1 %1265 }
 0x34f   :  { %v1360_v26 = vperm.slane %v3132_v48, %v3162_v42 }
 0x352   :  { %v3124_v0 = vpop.xlane.xlu0 %1259 }
 0x353   :  { %v1354_v19 = vperm.slane %v3124_v0, %v2594_v47 }
 0x355   :  { %v1358_v52 = vsel %vm1357_vm10, %v1356_v53, %v1354_v19 }
 0x356   :  { %v1362_v49 = vsel %vm1361_vm11, %v1360_v26, %v1358_v52 }
 0x35a   :  { %v3122_v20 = vpop.xlane.xlu2 %1268  ;;  %v3130_v40 = vpop.xlane.xlu0 %1271 }
 0x35b   :  { %v1363_v1 = vperm.slane %v3122_v20, %v2594_v47  ;;  %v1364_v31 = vperm.slane %v3130_v40, %v3159_v25 }
 0x35d   :  { %v1365_v53 = vsel %vm1357_vm10, %v1364_v31, %v1363_v1 }
 0x362   :  { %v3128_v36 = vpop.xlane.xlu2 %1274  ;;  %v3138_v28 = vpop.xlane.xlu0 %1277 }
 0x363   :  { %v3136_v43 = vpop.xlane.xlu1 %1280  ;;  %v1366_v51 = vperm.slane %v3128_v36, %v3162_v42  ;;  %v1368_v29 = vperm.slane %v3138_v28, %v2594_v47 }
 0x364   :  { %v1369_v21 = vperm.slane %v3136_v43, %v3159_v25 }
 0x365   :  { %v1367_v30 = vsel %vm1361_vm11, %v1366_v51, %v1365_v53 }
 0x366   :  { %v1370_v50 = vsel %vm1357_vm10, %v1369_v21, %v1368_v29  ;;  %v1399_v21 = vsel %vm1398_vm12, %v1367_v30, %v1362_v49 }
 0x36a   :  { %v3134_v39 = vpop.xlane.xlu2 %1283  ;;  %v3144_v59 = vpop.xlane.xlu0 %1286 }
 0x36b   :  { %v3142_v27 = vpop.xlane.xlu1 %1289  ;;  %v1371_v9 = vperm.slane %v3134_v39, %v3162_v42  ;;  %v1373_v46 = vperm.slane %v3144_v59, %v2594_v47 }
 0x36c   :  { %v1374_v63 = vperm.slane %v3142_v27, %v3159_v25 }
 0x36d   :  { %v1372_v1 = vsel %vm1361_vm11, %v1371_v9, %v1370_v50 }
 0x36e   :  { %v1375_v31 = vsel %vm1357_vm10, %v1374_v63, %v1373_v46  ;;  %v1401_v9 = vsel %vm1400_vm13, %v1372_v1, %v1399_v21 }
 0x372   :  { %v3140_v13 = vpop.xlane.xlu2 %1292  ;;  %v3150_v4 = vpop.xlane.xlu0 %1295 }
 0x373   :  { %v3148_v37 = vpop.xlane.xlu1 %1298  ;;  %v1378_v15 = vperm.slane %v3150_v4, %v2594_v47  ;;  %v1376_v61 = vperm.slane %v3140_v13, %v3162_v42 }
 0x374   :  { %v1379_v17 = vperm.slane %v3148_v37, %v3159_v25 }
 0x375   :  { %v1377_v35 = vsel %vm1361_vm11, %v1376_v61, %v1375_v31 }
 0x376   :  { %v1380_v32 = vsel %vm1357_vm10, %v1379_v17, %v1378_v15 }
 0x37a   :  { %v3146_v60 = vpop.xlane.xlu2 %1301  ;;  %v3156_v7 = vpop.xlane.xlu0 %1304 }
 0x37b   :  { %v3154_v55 = vpop.xlane.xlu1 %1307  ;;  %v1381_v5 = vperm.slane %v3146_v60, %v3162_v42  ;;  %v1383_v6 = vperm.slane %v3156_v7, %v2594_v47 }
 0x37c   :  { %v1384_v23 = vperm.slane %v3154_v55, %v3159_v25 }
 0x37d   :  { %v1382_v29 = vsel %vm1361_vm11, %v1381_v5, %v1380_v32  ;;  %v1403_v32 = vsel %vm1402_vm14, %v1377_v35, %v1401_v9 }
 0x37e   :  { %v1385_v26 = vsel %vm1357_vm10, %v1384_v23, %v1383_v6  ;;  %v1405_v23 = vsel %vm1404_vm15, %v1382_v29, %v1403_v32 }
 0x382   :  { %v3152_v14 = vpop.xlane.xlu2 %1310 }
 0x383   :  { %v1386_v58 = vperm.slane %v3152_v14, %v3162_v42 }
 0x385   :  { %v1387_v63 = vsel %vm1361_vm11, %v1386_v58, %v1385_v26 }
 0x386   :  { %v1407_v6 = vsel %vm1406_vm0, %v1387_v63, %v1405_v23 }
 0x396   :  { %v3168_v22 = vpop.xlane.xlu2 %1319  ;;  %v3176_v33 = vpop.xlane.xlu1 %1316 }
 0x397   :  { %v3178_v45 = vpop.xlane.xlu0 %1313  ;;  %v1389_v8 = vperm.slane %v3176_v33, %v3159_v25  ;;  %v1391_v38 = vperm.slane %v3168_v22, %v3162_v42 }
 0x398   :  { %v1388_v19 = vperm.slane %v3178_v45, %v2594_v47 }
 0x39a   :  { %v1390_v51 = vsel %vm1357_vm10, %v1389_v8, %v1388_v19 }
 0x39b   :  { %v1392_v5 = vsel %vm1361_vm11, %v1391_v38, %v1390_v51 }
 0x39c   :  { %v1409_v17 = vsel %vm1408_vm1, %v1392_v5, %v1407_v6 }
 0x3b4   :  { %v3225_v52 = vpop.xlane.xlu2 %1328  ;;  %v3227_v50 = vpop.xlane.xlu1 %1325 }
 0x3b5   :  { %v1396_v46 = vperm.slane %v3225_v52, %v3162_v42  ;;  %v1394_v15 = vperm.slane %v3227_v50, %v3159_v25  ;;  %v3235_v49 = vpop.xlane.xlu0 %1322 }
 0x3b6   :  { %v1393_v30 = vperm.slane %v3235_v49, %v2594_v47 }
 0x3b8   :  { %v1395_v58 = vsel %vm1357_vm10, %v1394_v15, %v1393_v30 }
 0x3b9   :  { %v1397_v61 = vsel %vm1361_vm11, %v1396_v46, %v1395_v58 }
 0x3ba   :  { %v1411_v35 = vsel %vm1410_vm2, %v1397_v61, %v1409_v17 }
 0x3bb   :  { %v1414_v8 = vsel %vm1413_vm3, %v1411_v35, -inf }
 0x3bc   :  { %1415 = vmax.xlane.f32.xlu0 %v1414_v8 }
 0x42f   :  { %v3248_v19 = vpop.xlane.xlu0 %1415 }
 0x430   :  { %v1419_v38 = vperm.slane %v3248_v19, 1  ;;  %v1418_v53 = vperm.slane %v3248_v19, 0  ;;  %v1420_v15 = vperm.slane %v3248_v19, 2  ;;  %v1421_v23 = vperm.slane %v3248_v19, 3 }
 0x432   :  { %v1437_v1 = vsub.f32 %v3122_v20, %v1419_v38  ;;  %v1435_v31 = vsub.f32 %v3126_v2, %v1418_v53  ;;  %v1434_v51 = vsub.f32 %v3124_v0, %v1418_v53  ;;  %v1436_v9 = vsub.f32 %v3132_v48, %v1418_v53 }
 0x433   :  { %v1439_v63 = vsub.f32 %v3128_v36, %v1419_v38  ;;  %v1438_v46 = vsub.f32 %v3130_v40, %v1419_v38  ;;  %v1441_v36 = vsub.f32 %v3136_v43, %v1420_v15  ;;  %v1442_v40 = vsub.f32 %v3134_v39, %v1420_v15 }
 0x434   :  { %v1464_v21 = vmul.f32 1.442695, %v1437_v1  ;;  %v1460_v29 = vmul.f32 1.442695, %v1435_v31  ;;  %v1458_v26 = vmul.f32 1.442695, %v1434_v51  ;;  %v1440_v48 = vsub.f32 %v3138_v28, %v1420_v15 }
 0x435   :  { %v1462_v32 = vmul.f32 1.442695, %v1436_v9  ;;  %v1468_v20 = vmul.f32 1.442695, %v1439_v63  ;;  %v1466_v2 = vmul.f32 1.442695, %v1438_v46  ;;  %v1444_v39 = vsub.f32 %v3142_v27, %v1421_v23 }
 0x436   :  { %2090 = vpow2.f32 %v1464_v21  ;;  %v1472_v58 = vmul.f32 1.442695, %v1441_v36  ;;  %v1474_v6 = vmul.f32 1.442695, %v1442_v40  ;;  %v1470_v17 = vmul.f32 1.442695, %v1440_v48 }
 0x437   :  { %2092 = vpow2.f32 %v1460_v29  ;;  %v1445_v28 = vsub.f32 %v3140_v13, %v1421_v23  ;;  %v1443_v8 = vsub.f32 %v3144_v59, %v1421_v23  ;;  %v1422_v38 = vperm.slane %v3248_v19, 4 }
 0x438   :  { %2094 = vpow2.f32 %v1458_v26  ;;  %v1478_v53 = vmul.f32 1.442695, %v1444_v39  ;;  %v1423_v26 = vperm.slane %v3248_v19, 5 }
 0x439   :  { %2096 = vpow2.f32 %v1462_v32  ;;  %v1480_v1 = vmul.f32 1.442695, %v1445_v28  ;;  %v1476_v51 = vmul.f32 1.442695, %v1443_v8  ;;  %v1447_v13 = vsub.f32 %v3148_v37, %v1422_v38 }
 0x43a   :  { %2098 = vpow2.f32 %v1468_v20  ;;  %v1448_v59 = vsub.f32 %v3146_v60, %v1422_v38  ;;  %v1446_v29 = vsub.f32 %v3150_v4, %v1422_v38  ;;  %v1450_v60 = vsub.f32 %v3154_v55, %v1423_v26 }
 0x43b   :  { %2100 = vpow2.f32 %v1466_v2  ;;  %v1484_v9 = vmul.f32 1.442695, %v1447_v13  ;;  %v1451_v4 = vsub.f32 %v3152_v14, %v1423_v26  ;;  %v1449_v20 = vsub.f32 %v3156_v7, %v1423_v26 }
 0x43c   :  { %v3259_v30 = vpop.eup %2090  ;;  %2102 = vpow2.f32 %v1472_v58  ;;  %v1486_v63 = vmul.f32 1.442695, %v1448_v59  ;;  %v1482_v15 = vmul.f32 1.442695, %v1446_v29  ;;  %v1424_v2 = vperm.slane %v3248_v19, 6 }
 0x43d   :  { %v3261_v0 = vpop.eup %2092  ;;  %1540 = vperm.xlu0 %2088, %v3259_v30   ;;  %2104 = vpow2.f32 %v1474_v6  ;;  %v1490_v36 = vmul.f32 1.442695, %v1450_v60  ;;  %v1492_v40 = vmul.f32 1.442695, %v1451_v4  ;;  %v1488_v23 = vmul.f32 1.442695, %v1449_v20 }
 0x43e   :  { %v3264_v5 = vpop.eup %2094  ;;  %1534 = vperm.xlu2 %2087, %v3261_v0   ;;  %2106 = vpow2.f32 %v1470_v17  ;;  %v1453_v14 = vsub.f32 %v3176_v33, %v1424_v2  ;;  %v1454_v7 = vsub.f32 %v3168_v22, %v1424_v2  ;;  %v1452_v6 = vsub.f32 %v3178_v45, %v1424_v2 }
 0x43f   :  { %1531 = vperm.xlu1 %2086, %v3264_v5   ;;  %v3272_v61 = vpop.eup %2096  ;;  %2108 = vpow2.f32 %v1478_v53  ;;  %v1425_v17 = vperm.slane %v3248_v19, 7 }
 0x440   :  { %v3274_v35 = vpop.eup %2098  ;;  %2110 = vpow2.f32 %v1480_v1  ;;  %v1496_v39 = vmul.f32 1.442695, %v1453_v14  ;;  %v1498_v28 = vmul.f32 1.442695, %v1454_v7  ;;  %v1494_v38 = vmul.f32 1.442695, %v1452_v6 }
 0x441   :  { %v3277_v43 = vpop.eup %2100  ;;  %2112 = vpow2.f32 %v1476_v51  ;;  %v1456_v22 = vsub.f32 %v3227_v50, %v1425_v17  ;;  %v1457_v45 = vsub.f32 %v3225_v52, %v1425_v17  ;;  %v1455_v19 = vsub.f32 %v3235_v49, %v1425_v17 }
 0x442   :  { %v3285_v31 = vpop.eup %2102  ;;  %2114 = vpow2.f32 %v1484_v9 }
 0x443   :  { %v3287_v21 = vpop.eup %2104  ;;  %2116 = vpow2.f32 %v1486_v63  ;;  %v1502_v1 = vmul.f32 1.442695, %v1456_v22  ;;  %v1504_v51 = vmul.f32 1.442695, %v1457_v45  ;;  %v1500_v59 = vmul.f32 1.442695, %v1455_v19 }
 0x444   :  { %v3290_v27 = vpop.eup %2106  ;;  %2118 = vpow2.f32 %v1482_v15 }
 0x445   :  { %1537 = vperm.xlu0 %2088, %v3272_v61   ;;  %v3298_v46 = vpop.eup %2108  ;;  %2120 = vpow2.f32 %v1490_v36 }
 0x446   :  { %1546 = vperm.xlu2 %2087, %v3274_v35   ;;  %v3300_v32 = vpop.eup %2110  ;;  %2122 = vpow2.f32 %v1492_v40 }
 0x447   :  { %1543 = vperm.xlu1 %2086, %v3277_v43   ;;  %v3303_v37 = vpop.eup %2112  ;;  %2124 = vpow2.f32 %v1488_v23 }
 0x448   :  { %v3311_v48 = vpop.eup %2114  ;;  %2126 = vpow2.f32 %v1496_v39 }
 0x449   :  { %v3313_v58 = vpop.eup %2116  ;;  %2128 = vpow2.f32 %v1498_v28 }
 0x44a   :  { %v3316_v55 = vpop.eup %2118  ;;  %2130 = vpow2.f32 %v1494_v38 }
 0x44b   :  { %v3324_v8 = vpop.eup %2120  ;;  %2132 = vpow2.f32 %v1502_v1 }
 0x44c   :  { %v3326_v53 = vpop.eup %2122  ;;  %2134 = vpow2.f32 %v1504_v51 }
 0x44d   :  { %1552 = vperm.xlu0 %2088, %v3285_v31   ;;  %v3329_v33 = vpop.eup %2124  ;;  %2136 = vpow2.f32 %v1500_v59 }
 0x44e   :  { %1555 = vperm.xlu2 %2087, %v3287_v21   ;;  %v3336_v13 = vpop.eup %2126 }
 0x44f   :  { %1549 = vperm.xlu1 %2086, %v3290_v27   ;;  %v3338_v29 = vpop.eup %2128 }
 0x450   :  { %v3341_v26 = vpop.eup %2130 }
 0x451   :  { %v3345_v52 = vpop.eup %2132 }
 0x452   :  { %v3347_v50 = vpop.eup %2134 }
 0x453   :  { %v3350_v49 = vpop.eup %2136 }
 0x455   :  { %1561 = vperm.xlu0 %2088, %v3298_v46  }
 0x456   :  { %1564 = vperm.xlu2 %2087, %v3300_v32  }
 0x457   :  { %1558 = vperm.xlu1 %2086, %v3303_v37  }
 0x45d   :  { %1570 = vperm.xlu0 %2088, %v3311_v48  }
 0x45e   :  { %1573 = vperm.xlu2 %2087, %v3313_v58  }
 0x45f   :  { %1567 = vperm.xlu1 %2086, %v3316_v55  }
 0x465   :  { %1579 = vperm.xlu0 %2088, %v3324_v8  }
 0x466   :  { %1582 = vperm.xlu2 %2087, %v3326_v53  }
 0x467   :  { %1576 = vperm.xlu1 %2086, %v3329_v33  }
 0x46d   :  { %1588 = vperm.xlu0 %2088, %v3336_v13  }
 0x46e   :  { %1591 = vperm.xlu2 %2087, %v3338_v29  }
 0x46f   :  { %1585 = vperm.xlu1 %2086, %v3341_v26  }
 0x475   :  { %1597 = vperm.xlu0 %2088, %v3345_v52  }
 0x476   :  { %1600 = vperm.xlu2 %2087, %v3347_v50  }
 0x477   :  { %1594 = vperm.xlu1 %2086, %v3350_v49  }
 0x498   :  { %v1535_v9 = vpop.permute.xlu2 %1534 }
 0x4a0   :  { %v1547_v63 = vpop.permute.xlu2 %1546 }
 0x4a8   :  { %v1556_v4 = vpop.permute.xlu2 %1555 }
 0x4af   :  { %v1541_v15 = vpop.permute.xlu0 %1540 }
 0x4b0   :  { %v1565_v40 = vpop.permute.xlu2 %1564  ;;  %v1607_v10 = vperm.slane %v1541_v15, %v2594_v47 }
 0x4b1   :  { %v1532_v60 = vpop.permute.xlu1 %1531 }
 0x4b2   :  { %v1602_v11 = vperm.slane %v1532_v60, %v2594_v47  ;;  %v1610_v60 = vperm.slane %v1547_v63, %v3162_v42 }
 0x4b7   :  { %v1538_v20 = vpop.permute.xlu0 %1537 }
 0x4b8   :  { %v1574_v6 = vpop.permute.xlu2 %1573  ;;  %v1605_v34 = vperm.slane %v1538_v20, %v3162_v42 }
 0x4b9   :  { %v1544_v2 = vpop.permute.xlu1 %1543 }
 0x4ba   :  { %v1608_v45 = vperm.slane %v1544_v2, %v3159_v25 }
 0x4bf   :  { %v1553_v36 = vpop.permute.xlu0 %1552 }
 0x4c0   :  { %v1583_v28 = vpop.permute.xlu2 %1582  ;;  %v1613_v1 = vperm.slane %v1553_v36, %v3159_v25  ;;  %v1603_v36 = vperm.slane %v1535_v9, %v3159_v25 }
 0x4c1   :  { %v1550_v23 = vpop.permute.xlu1 %1549 }
 0x4c2   :  { %v1612_v51 = vperm.slane %v1550_v23, %v2594_v47  ;;  %v1609_v23 = vsel %vm1357_vm10, %v1608_v45, %v1607_v10  ;;  %v1620_v10 = vperm.slane %v1565_v40, %v3162_v42  ;;  %v1625_v45 = vperm.slane %v1574_v6, %v3162_v42 }
 0x4c7   :  { %v1562_v14 = vpop.permute.xlu0 %1561 }
 0x4c8   :  { %v1592_v19 = vpop.permute.xlu2 %1591  ;;  %v1618_v12 = vperm.slane %v1562_v14, %v3159_v25  ;;  %v1614_v14 = vsel %vm1357_vm10, %v1613_v1, %v1612_v51 }
 0x4c9   :  { %v1559_v7 = vpop.permute.xlu1 %1558 }
 0x4ca   :  { %v1617_v41 = vperm.slane %v1559_v7, %v2594_v47 }
 0x4cc   :  { %v1619_v9 = vsel %vm1357_vm10, %v1618_v12, %v1617_v41 }
 0x4cf   :  { %v1571_v17 = vpop.permute.xlu0 %1570 }
 0x4d0   :  { %v1623_v24 = vperm.slane %v1571_v17, %v3159_v25  ;;  %v1615_v17 = vperm.slane %v1556_v4, %v3162_v42  ;;  %v1630_v4 = vperm.slane %v1583_v28, %v3162_v42  ;;  %v1601_v51 = vpop.permute.xlu2 %1600 }
 0x4d1   :  { %v1568_v39 = vpop.permute.xlu1 %1567 }
 0x4d2   :  { %v1622_v2 = vperm.slane %v1568_v39, %v2594_v47  ;;  %v1604_v39 = vsel %vm1357_vm10, %v1603_v36, %v1602_v11  ;;  %v1616_v1 = vsel %vm1361_vm11, %v1615_v17, %v1614_v14  ;;  %v1621_v11 = vsel %vm1361_vm11, %v1620_v10, %v1619_v9 }
 0x4d4   :  { %v1624_v63 = vsel %vm1357_vm10, %v1623_v24, %v1622_v2 }
 0x4d5   :  { %v1626_v24 = vsel %vm1361_vm11, %v1625_v45, %v1624_v63 }
 0x4d7   :  { %v1580_v38 = vpop.permute.xlu0 %1579 }
 0x4d8   :  { %v1628_v18 = vperm.slane %v1580_v38, %v3159_v25  ;;  %v1606_v38 = vsel %vm1361_vm11, %v1605_v34, %v1604_v39  ;;  %v1635_v34 = vperm.slane %v1592_v19, %v3162_v42 }
 0x4d9   :  { %v1577_v22 = vpop.permute.xlu1 %1576 }
 0x4da   :  { %v1627_v15 = vperm.slane %v1577_v22, %v2594_v47  ;;  %v1611_v22 = vsel %vm1361_vm11, %v1610_v60, %v1609_v23 }
 0x4db   :  { %v1642_v40 = vsel %vm1398_vm12, %v1611_v22, %v1606_v38 }
 0x4df   :  { %v1589_v59 = vpop.permute.xlu0 %1588 }
 0x4e0   :  { %v1633_v7 = vperm.slane %v1589_v59, %v3159_v25  ;;  %v1643_v59 = vsel %vm1400_vm13, %v1616_v1, %v1642_v40 }
 0x4e1   :  { %v1586_v56 = vpop.permute.xlu1 %1585  ;;  %v1644_v28 = vsel %vm1402_vm14, %v1621_v11, %v1643_v59 }
 0x4e2   :  { %v1632_v20 = vperm.slane %v1586_v56, %v2594_v47  ;;  %v1629_v56 = vsel %vm1357_vm10, %v1628_v18, %v1627_v15  ;;  %v1640_v15 = vperm.slane %v1601_v51, %v3162_v42  ;;  %v1645_v19 = vsel %vm1404_vm15, %v1626_v24, %v1644_v28 }
 0x4e3   :  { %v1631_v18 = vsel %vm1361_vm11, %v1630_v4, %v1629_v56 }
 0x4e4   :  { %v1634_v41 = vsel %vm1357_vm10, %v1633_v7, %v1632_v20  ;;  %v1646_v14 = vsel %vm1406_vm0, %v1631_v18, %v1645_v19 }
 0x4e5   :  { %v1636_v23 = vsel %vm1361_vm11, %v1635_v34, %v1634_v41 }
 0x4e6   :  { %v1647_v7 = vsel %vm1408_vm1, %v1636_v23, %v1646_v14 }
 0x4e7   :  { %v1598_v12 = vpop.permute.xlu0 %1597 }
 0x4e8   :  { %v1638_v6 = vperm.slane %v1598_v12, %v3159_v25 }
 0x4e9   :  { %v1595_v2 = vpop.permute.xlu1 %1594 }
 0x4ea   :  { %v1637_v36 = vperm.slane %v1595_v2, %v2594_v47 }
 0x4ec   :  { %v1639_v60 = vsel %vm1357_vm10, %v1638_v6, %v1637_v36 }
 0x4ed   :  { %v1641_v25 = vsel %vm1361_vm11, %v1640_v15, %v1639_v60 }
 0x4ee   :  { %v1648_v20 = vsel %vm1410_vm2, %v1641_v25, %v1647_v7 }
 0x4ef   :  { %v1650_v17 = vsel %vm1413_vm3, %v1648_v20, 0.0 }
 0x4f0   :  { %1651 = vadd.xlane.f32.xlu1 %v1650_v17 }
 0x563   :  { %v1652_v47 = vpop.xlane.xlu1 %1651 }
 0x564   :  { %2138 = vrcp.f32 %v1652_v47  ;;  %v1664_v10 = vand.u32 2147483648, %v1652_v47  ;;  %v1662_v22 = vand.u32 2147483647, %v1652_v47  ;;  %vm1658_vm5 = vweird.f32 %v1652_v47 }
 0x566   :  { %v1665_v45 = vor.u32 1.1754944e-38, %v1664_v10  ;;  %vm1663_vm9 = vcmp.eq.f32.partialorder %v1662_v22, 8.507059e+37 }
 0x56a   :  { %v2139_v39 = vpop.eup %2138 }
 0x56b   :  { %v1654_v9 = vmul.f32 %v2139_v39, %v1652_v47  ;;  %vm1659_vm4 = vweird.f32 %v2139_v39 }
 0x56c   :  { %vm1660_vm8 = vmor %vm1658_vm5, %vm1659_vm4 }
 0x56d   :  { %v1655_v42 = vsub.f32 1.0, %v1654_v9 }
 0x56f   :  { %v1656_v38 = vmul.f32 %v2139_v39, %v1655_v42 }
 0x571   :  { %v1657_v63 = vadd.f32 %v2139_v39, %v1656_v38 }
 0x573   :  { %v1661_v1 = vsel %vm1660_vm8, %v2139_v39, %v1657_v63 }
 0x574   :  { %v1666_v56 = vsel %vm1663_vm9, %v1665_v45, %v1661_v1 }
 0x575   :  { %v1670_v4 = vperm.slane %v1666_v56, 2  ;;  %v1668_v11 = vperm.slane %v1666_v56, 0  ;;  %v1674_v34 = vperm.slane %v1666_v56, 6  ;;  %v1669_v51 = vperm.slane %v1666_v56, 1 }
 0x576   :  { %v1675_v18 = vperm.slane %v1666_v56, 7  ;;  %v1673_v36 = vperm.slane %v1666_v56, 5 }
 0x577   :  { %v1692_v41 = vmul.f32 %v3287_v21, %v1670_v4  ;;  %v1685_v12 = vmul.f32 %v3261_v0, %v1668_v11  ;;  %v1684_v40 = vmul.f32 %v3264_v5, %v1668_v11  ;;  %v1703_v24 = vmul.f32 %v3336_v13, %v1674_v34 }
 0x578   :  { %v1688_v6 = vmul.f32 %v3277_v43, %v1669_v51  ;;  %v1687_v59 = vmul.f32 %v3259_v30, %v1669_v51  ;;  %v1706_v21 = vmul.f32 %v3345_v52, %v1675_v18  ;;  %v1691_v0 = vmul.f32 %v3285_v31, %v1670_v4 }
 0x579   :  { %1750 = vperm.xlu1 %2086, %v1692_v41   ;;  %1715 = vperm.xlu2 %2087, %v1685_v12   ;;  %v1690_v5 = vmul.f32 %v3290_v27, %v1670_v4  ;;  %v1689_v2 = vmul.f32 %v3274_v35, %v1669_v51  ;;  %v1686_v13 = vmul.f32 %v3272_v61, %v1668_v11  ;;  %v1671_v30 = vperm.slane %v1666_v56, 3 }
 0x57a   :  { %1710 = vperm.xlu0 %2088, %v1684_v40   ;;  %v1672_v52 = vperm.slane %v1666_v56, 4  ;;  %v1699_v35 = vmul.f32 %v3329_v33, %v1673_v36  ;;  %v1701_v23 = vmul.f32 %v3326_v53, %v1673_v36  ;;  %v1705_v33 = vmul.f32 %v3350_v49, %v1675_v18 }
 0x57b   :  { %v1694_v43 = vmul.f32 %v3298_v46, %v1671_v30  ;;  %v1693_v28 = vmul.f32 %v3303_v37, %v1671_v30  ;;  %v1695_v61 = vmul.f32 %v3300_v32, %v1671_v30  ;;  %v1700_v37 = vmul.f32 %v3324_v8, %v1673_v36  ;;  %v3558_v30 = vld [vmem:[#allocation8_spill] sm:$0xff] }
 0x57c   :  { %v1697_v31 = vmul.f32 %v3311_v48, %v1672_v52  ;;  %v1696_v27 = vmul.f32 %v3316_v55, %v1672_v52  ;;  %v1698_v46 = vmul.f32 %v3313_v58, %v1672_v52  ;;  %v1702_v48 = vmul.f32 %v3341_v26, %v1674_v34 }
 0x57d   :  { %v1704_v55 = vmul.f32 %v3338_v29, %v1674_v34  ;;  %v1707_v32 = vmul.f32 %v3347_v50, %v1675_v18 }
 0x581   :  { %1805 = vperm.xlu1 %2086, %v1703_v24   ;;  %1730 = vperm.xlu2 %2087, %v1688_v6  }
 0x582   :  { %1725 = vperm.xlu0 %2088, %v1687_v59  }
 0x589   :  { %1820 = vperm.xlu1 %2086, %v1706_v21   ;;  %1745 = vperm.xlu2 %2087, %v1691_v0  }
 0x58a   :  { %1740 = vperm.xlu0 %2088, %v1690_v5  }
 0x591   :  { %1735 = vperm.xlu2 %2087, %v1689_v2   ;;  %v3557_v2 = vld [vmem:[#allocation5_spill] sm:$0xff] }
 0x592   :  { %1720 = vperm.xlu0 %2088, %v1686_v13  }
 0x599   :  { %1760 = vperm.xlu2 %2087, %v1694_v43  }
 0x59a   :  { %1755 = vperm.xlu0 %2088, %v1693_v28   ;;  %v3559_v28 = vld [vmem:[#allocation6_spill] sm:$0xff] }
 0x5a1   :  { %1775 = vperm.xlu2 %2087, %v1697_v31  }
 0x5a2   :  { %1770 = vperm.xlu0 %2088, %v1696_v27   ;;  %v3560_v27 = vld [vmem:[#allocation9_spill] sm:$0xff] }
 0x5a9   :  { %1785 = vperm.xlu2 %2087, %v1699_v35   ;;  %v3561_v35 = vld [vmem:[#allocation10_spill] sm:$0xff] }
 0x5aa   :  { %1765 = vperm.xlu0 %2088, %v1695_v61  }
 0x5b1   :  { %1780 = vperm.xlu2 %2087, %v1698_v46   ;;  %v3562_v46 = vld [vmem:[#allocation15_spill] sm:$0xff] }
 0x5b2   :  { %1790 = vperm.xlu0 %2088, %v1700_v37  }
 0x5b9   :  { %1795 = vperm.xlu2 %2087, %v1701_v23  }
 0x5ba   :  { %1800 = vperm.xlu0 %2088, %v1702_v48   ;;  %v3563_v48 = vld [vmem:[#allocation11_spill] sm:$0xff] }
 0x5c1   :  { %1810 = vperm.xlu2 %2087, %v1704_v55  }
 0x5c2   :  { %1815 = vperm.xlu0 %2088, %v1705_v33   ;;  %v3564_v33 = vld [vmem:[#allocation7_spill] sm:$0xff] }
 0x5ca   :  { %1825 = vperm.xlu0 %2088, %v1707_v32  }
 0x5d3   :  { %v1716_v58 = vpop.permute.xlu2 %1715 }
 0x5d4   :  { %v1829_v19 = vmul.f32 %v2951_v16, %v1716_v58  ;;  %v3565_v58 = vld [vmem:[#allocation14_spill] sm:$0xff] }
 0x5d6   :  { %v1853_v14 = vsel %vm449_vm6, %v1829_v19, 0.0 }
 0x5db   :  { %v1731_v15 = vpop.permute.xlu2 %1730 }
 0x5dc   :  { %v1832_v49 = vmul.f32 %v2978_v62, %v1731_v15 }
 0x5de   :  { %v1864_v20 = vsel %vm449_vm6, %v1832_v49, 0.0 }
 0x5e3   :  { %v1746_v8 = vpop.permute.xlu2 %1745 }
 0x5e4   :  { %v1835_v52 = vmul.f32 %v3559_v28, %v1746_v8  ;;  %v1941_v28 = vld [vmem:[%s3519_s7 + $0x8] sm:$0xff] }
 0x5eb   :  { %v1736_v26 = vpop.permute.xlu2 %1735  ;;  %v1751_v0 = vpop.permute.xlu1 %1750 }
 0x5ec   :  { %v1711_v60 = vpop.permute.xlu0 %1710  ;;  %v1833_v17 = vmul.f32 %v2990_v54, %v1736_v26  ;;  %v1836_v32 = vmul.f32 %v3564_v33, %v1751_v0 }
 0x5ed   :  { %v1828_v53 = vmul.f32 %v2967_v44, %v1711_v60  ;;  %v1875_v60 = vsel %vm449_vm6, %v1835_v52, 0.0 }
 0x5ee   :  { %v1866_v44 = vsel %vm634_vm7, %v1833_v17, 0.0 }
 0x5ef   :  { %v1852_v29 = vsel %vm449_vm6, %v1828_v53, 0.0  ;;  %v3566_v53 = vld [vmem:[#allocation12_spill] sm:$0xff] }
 0x5f0   :  { %v1854_v25 = vadd.f32 %v1853_v14, %v1852_v29  ;;  %v1947_v14 = vld [vmem:[%s3519_s7 + $0x38] sm:$0xff]  ;;  %v1946_v29 = vld [vmem:[%s3519_s7 + $0x30] sm:$0xff] }
 0x5f1   :  { %1973 = vmatpush.msra.mxu2 %v1947_v14 }
 0x5f3   :  { %v1761_v47 = vpop.permute.xlu2 %1760  ;;  %v1806_v8 = vpop.permute.xlu1 %1805  ;;  %1974 = vmatpush.msra.mxu2 %v1946_v29 }
 0x5f4   :  { %v1726_v7 = vpop.permute.xlu0 %1725  ;;  %v1838_v36 = vmul.f32 %v3560_v27, %v1761_v47  ;;  %v1945_v47 = vld [vmem:[%s3519_s7 + $0x28] sm:$0xff] }
 0x5f5   :  { %v1831_v50 = vmul.f32 %v2981_v3, %v1726_v7  ;;  %1975 = vmatpush.msra.mxu2 %v1945_v47 }
 0x5f7   :  { %v1863_v16 = vsel %vm449_vm6, %v1831_v50, 0.0 }
 0x5f8   :  { %v1865_v39 = vadd.f32 %v1864_v20, %v1863_v16 }
 0x5fa   :  { %v1867_v9 = vadd.f32 %v1866_v44, %v1865_v39  ;;  %v1877_v39 = vsel %vm634_vm7, %v1836_v32, 0.0  ;;  %v3567_v44 = vld [vmem:[#allocation18_spill] sm:$0xff] }
 0x5fb   :  { %v1776_v38 = vpop.permute.xlu2 %1775 }
 0x5fc   :  { %v1741_v42 = vpop.permute.xlu0 %1740  ;;  %v1868_v10 = vrot.slane %v1867_v9, 4  ;;  %v1841_v26 = vmul.f32 %v3566_v53, %v1776_v38 }
 0x5fd   :  { %v1834_v13 = vmul.f32 %v3557_v2, %v1741_v42 }
 0x5fe   :  { %v1869_v22 = vadd.f32 %v1868_v10, %v1867_v9  ;;  %v1847_v9 = vmul.f32 %v3567_v44, %v1806_v8  ;;  %v3568_v10 = vld [vmem:[#allocation16_spill] sm:$0xff] }
 0x5ff   :  { %v1874_v23 = vsel %vm449_vm6, %v1834_v13, 0.0 }
 0x600   :  { %v1870_v45 = vrot.slane %v1869_v22, 2  ;;  %v1876_v49 = vadd.f32 %v1875_v60, %v1874_v23  ;;  %v3572_v23 = vld [vmem:[#allocation22_spill] sm:$0xff] }
 0x602   :  { %v1871_v54 = vadd.f32 %v1870_v45, %v1869_v22  ;;  %v1897_v22 = vsel %vm449_vm6, %v1841_v26, 0.0 }
 0x603   :  { %v1786_v4 = vpop.permute.xlu2 %1785 }
 0x604   :  { %v1721_v63 = vpop.permute.xlu0 %1720  ;;  %v1872_v40 = vrot.slane %v1871_v54, 1  ;;  %v1843_v15 = vmul.f32 %v3565_v58, %v1786_v4 }
 0x605   :  { %v1830_v62 = vmul.f32 %v2958_v57, %v1721_v63  ;;  %v3569_v63 = vld [vmem:[#allocation13_spill] sm:$0xff] }
 0x606   :  { %v1873_v24 = vadd.f32 %v1872_v40, %v1871_v54  ;;  %v1907_v42 = vsel %vm449_vm6, %v1843_v15, 0.0  ;;  %v1878_v54 = vadd.f32 %v1877_v39, %v1876_v49 }
 0x607   :  { %v1855_v3 = vsel %vm634_vm7, %v1830_v62, 0.0 }
 0x608   :  { %v1856_v1 = vadd.f32 %v1855_v3, %v1854_v25  ;;  %v1886_v25 = vsel %vm449_vm6, %v1838_v36, 0.0  ;;  %v1879_v2 = vrot.slane %v1878_v54, 4  ;;  %v1940_v36 = vld [vmem:[%s3519_s7] sm:$0xff] }
 0x60a   :  { %v1857_v56 = vrot.slane %v1856_v1, 4 }
 0x60b   :  { %v1781_v57 = vpop.permute.xlu2 %1780 }
 0x60c   :  { %v1858_v11 = vadd.f32 %v1857_v56, %v1856_v1  ;;  %v1756_v41 = vpop.permute.xlu0 %1755  ;;  %v1842_v62 = vmul.f32 %v3569_v63, %v1781_v57  ;;  %v1944_v56 = vld [vmem:[%s3519_s7 + $0x20] sm:$0xff] }
 0x60d   :  { %v1837_v43 = vmul.f32 %v3558_v30, %v1756_v41  ;;  %1976 = vmatpush.msra.mxu2 %v1944_v56 }
 0x60e   :  { %v1859_v12 = vrot.slane %v1858_v11, 2 }
 0x60f   :  { %v1885_v19 = vsel %vm449_vm6, %v1837_v43, 0.0 }
 0x610   :  { %v1860_v34 = vadd.f32 %v1859_v12, %v1858_v11  ;;  %v1887_v20 = vadd.f32 %v1886_v25, %v1885_v19  ;;  %v3570_v11 = vld [vmem:[#allocation17_spill] sm:$0xff]  ;;  %v3571_v12 = vld [vmem:[#allocation19_spill] sm:$0xff] }
 0x612   :  { %v1861_v51 = vrot.slane %v1860_v34, 1 }
 0x613   :  { %v1796_v5 = vpop.permute.xlu2 %1795 }
 0x614   :  { %v1862_v6 = vadd.f32 %v1861_v51, %v1860_v34  ;;  %v1771_v59 = vpop.permute.xlu0 %1770  ;;  %v1845_v38 = vmul.f32 %v3568_v10, %v1796_v5  ;;  %v1943_v34 = vld [vmem:[%s3519_s7 + $0x18] sm:$0xff]  ;;  %v1919_v51 = vsel %vm449_vm6, %v1847_v9, 0.0  ;;  %v1942_v5 = vld [vmem:[%s3519_s7 + $0x10] sm:$0xff]  ;;  %s2168_s7 = smov [#allocation2]  }
 0x615   :  { %v1840_v55 = vmul.f32 %v3563_v48, %v1771_v59  ;;  %v1899_v59 = vsel %vm634_vm7, %v1842_v62, 0.0  ;;  %1977 = vmatpush.msra.mxu2 %v1943_v34  ;;  %s1991_s25 = sshll.u32 %s2168_s7, 4  ;;  %s1992_s25 = int_to_ptr.vmem [resolvable:$true] %s1991_s25 }
 0x616   :  { %v3439_v18 = vsel %vm1398_vm12, %v1873_v24, %v1862_v6  ;;  %v1910_v24 = vsel %vm634_vm7, %v1845_v38, 0.0 }
 0x617   :  { %v1896_v17 = vsel %vm449_vm6, %v1840_v55, 0.0  ;;  %1978 = vmatpush.msra.mxu2 %v1942_v5  ;;  %v3573_v55 = vld [vmem:[#allocation21_spill] sm:$0xff] }
 0x618   :  { %v1898_v4 = vadd.f32 %v1897_v22, %v1896_v17 }
 0x619   :  { %1979 = vmatpush.msra.mxu2 %v1941_v28 }
 0x61a   :  { %v1900_v13 = vadd.f32 %v1899_v59, %v1898_v4 }
 0x61b   :  { %v1811_v16 = vpop.permute.xlu2 %1810  ;;  %1980 = vmatpush.msra.mxu2 %v1940_v36 }
 0x61c   :  { %v1766_v21 = vpop.permute.xlu0 %1765  ;;  %v1848_v41 = vmul.f32 %v3570_v11, %v1811_v16 }
 0x61d   :  { %v1839_v61 = vmul.f32 %v3561_v35, %v1766_v21  ;;  %v1821_v35 = vpop.permute.xlu1 %1820 }
 0x61e   :  { %v1921_v30 = vsel %vm634_vm7, %v1848_v41, 0.0  ;;  %v1850_v33 = vmul.f32 %v3573_v55, %v1821_v35 }
 0x61f   :  { %v1888_v7 = vsel %vm634_vm7, %v1839_v61, 0.0  ;;  %v1880_v61 = vadd.f32 %v1879_v2, %v1878_v54 }
 0x620   :  { %v1889_v3 = vadd.f32 %v1888_v7, %v1887_v20  ;;  %v1930_v53 = vsel %vm449_vm6, %v1850_v33, 0.0 }
 0x621   :  { %v1881_v15 = vrot.slane %v1880_v61, 2 }
 0x622   :  { %v1890_v57 = vrot.slane %v1889_v3, 4 }
 0x623   :  { %v1882_v25 = vadd.f32 %v1881_v15, %v1880_v61 }
 0x624   :  { %v1791_v31 = vpop.permute.xlu0 %1790  ;;  %v1891_v52 = vadd.f32 %v1890_v57, %v1889_v3 }
 0x625   :  { %v1844_v37 = vmul.f32 %v3562_v46, %v1791_v31  ;;  %v1901_v46 = vrot.slane %v1900_v13, 4  ;;  %v1883_v9 = vrot.slane %v1882_v25, 1 }
 0x626   :  { %v1892_v32 = vrot.slane %v1891_v52, 2 }
 0x627   :  { %v1908_v50 = vsel %vm449_vm6, %v1844_v37, 0.0  ;;  %v1902_v19 = vadd.f32 %v1901_v46, %v1900_v13  ;;  %v1884_v3 = vadd.f32 %v1883_v9, %v1882_v25 }
 0x628   :  { %v1909_v45 = vadd.f32 %v1908_v50, %v1907_v42  ;;  %v1893_v26 = vadd.f32 %v1892_v32, %v1891_v52  ;;  %v3574_v50 = vld [vmem:[#allocation20_spill] sm:$0xff] }
 0x629   :  { %v1903_v49 = vrot.slane %v1902_v19, 2  ;;  %v1957_v54 = vsel %vm1400_vm13, %v1884_v3, %v3439_v18 }
 0x62a   :  { %v1911_v21 = vadd.f32 %v1910_v24, %v1909_v45  ;;  %v1894_v47 = vrot.slane %v1893_v26, 1 }
 0x62b   :  { %v1904_v42 = vadd.f32 %v1903_v49, %v1902_v19 }
 0x62c   :  { %v1801_v1 = vpop.permute.xlu0 %1800  ;;  %v1912_v31 = vrot.slane %v1911_v21, 4  ;;  %v1895_v22 = vadd.f32 %v1894_v47, %v1893_v26 }
 0x62d   :  { %v1846_v40 = vmul.f32 %v3571_v12, %v1801_v1  ;;  %v1905_v45 = vrot.slane %v1904_v42, 1 }
 0x62e   :  { %v1913_v58 = vadd.f32 %v1912_v31, %v1911_v21  ;;  %v1958_v41 = vsel %vm1402_vm14, %v1895_v22, %v1957_v54 }
 0x62f   :  { %v1918_v6 = vsel %vm449_vm6, %v1846_v40, 0.0  ;;  %v1906_v12 = vadd.f32 %v1905_v45, %v1904_v42 }
 0x630   :  { %v1920_v0 = vadd.f32 %v1919_v51, %v1918_v6  ;;  %v1914_v14 = vrot.slane %v1913_v58, 2 }
 0x631   :  { %v1959_v51 = vsel %vm1404_vm15, %v1906_v12, %v1958_v41 }
 0x632   :  { %v1922_v43 = vadd.f32 %v1921_v30, %v1920_v0  ;;  %v1915_v39 = vadd.f32 %v1914_v14, %v1913_v58 }
 0x634   :  { %v1816_v27 = vpop.permute.xlu0 %1815  ;;  %v1923_v37 = vrot.slane %v1922_v43, 4  ;;  %v1916_v63 = vrot.slane %v1915_v39, 1 }
 0x635   :  { %v1849_v48 = vmul.f32 %v3572_v23, %v1816_v27 }
 0x636   :  { %v1924_v60 = vadd.f32 %v1923_v37, %v1922_v43  ;;  %v1917_v11 = vadd.f32 %v1916_v63, %v1915_v39 }
 0x637   :  { %v1929_v8 = vsel %vm449_vm6, %v1849_v48, 0.0 }
 0x638   :  { %v1925_v7 = vrot.slane %v1924_v60, 2  ;;  %v1931_v17 = vadd.f32 %v1930_v53, %v1929_v8  ;;  %v1960_v6 = vsel %vm1406_vm0, %v1917_v11, %v1959_v51 }
 0x63a   :  { %v1926_v10 = vadd.f32 %v1925_v7, %v1924_v60 }
 0x63c   :  { %v1826_v29 = vpop.permute.xlu0 %1825  ;;  %v1927_v1 = vrot.slane %v1926_v10, 1 }
 0x63d   :  { %v1851_v20 = vmul.f32 %v3574_v50, %v1826_v29 }
 0x63e   :  { %v1928_v40 = vadd.f32 %v1927_v1, %v1926_v10 }
 0x63f   :  { %v1932_v16 = vsel %vm634_vm7, %v1851_v20, 0.0 }
 0x640   :  { %v1933_v44 = vadd.f32 %v1932_v16, %v1931_v17  ;;  %v1961_v59 = vsel %vm1408_vm1, %v1928_v40, %v1960_v6 }
 0x642   :  { %v1934_v38 = vrot.slane %v1933_v44, 4 }
 0x644   :  { %v1935_v62 = vadd.f32 %v1934_v38, %v1933_v44 }
 0x646   :  { %v1936_v56 = vrot.slane %v1935_v62, 2 }
 0x648   :  { %v1937_v4 = vadd.f32 %v1936_v56, %v1935_v62 }
 0x64a   :  { %v1938_v34 = vrot.slane %v1937_v4, 1 }
 0x64c   :  { %v1939_v24 = vadd.f32 %v1938_v34, %v1937_v4 }
 0x64e   :  { %v1962_v57 = vsel %vm1410_vm2, %v1939_v24, %v1961_v59 }
 0x64f   :  { %2028 = vmatmul.msk.f32.vlgmr.msra.gmra.mxu2 %vm449_vm6, %v1962_v57 }
 0x6d2   :  { %v1982_v18 = vpop.f32.mrf.mxu2 }
 0x6d3   :  { %1985 = vst [vmem:[#allocation2] sm:$0xff] %v1982_v18 }
 0x6d4   :  { %1996 = dma.vmem_to_hbm [thread:$0]  %s1992_s25, 128, %s1994_s26, [#allocation3]  }
 0x6d5   :  { %2164 = dma.done.wait [#allocation3], 128  }
 0x6d6   :  { %2165 = vsyncadd [#allocation3], 4294967168 }
 0x6d7   :  { %2001 = vsyncpa [#allocation3], 1 }

</bundles_post_ra>
